<compile_context>
chip_gen: v6e
topology: v6e:2x2x1
jax: 0.10.0
libtpu: 0.0.40
codegen_flags: <defaults>
</compile_context>

<pallas_src>
import functools
import math

import jax
import jax.numpy as jnp
from jax.experimental import pallas as pl
from jax.experimental.pallas import tpu as pltpu


# ----------------------------------------------------------------------------
# Fused whole-network kernel (transposed, batch-flattened layout)
# ----------------------------------------------------------------------------
def _fused_gcn_kernel(*refs, num_stage):
    """refs = (xT,
               gc1: wT, attT, scaleT, shiftT,
               per block: wT1, attT1, scaleT1, shiftT1, wT2, attT2, scaleT2, shiftT2,
               gc7: wT, attT, shiftT,
               outT)

    Layouts (M = B * node_n):
      activations  yT      : (F,  M)    f32
      weights      wT      : (Fo, Fi)   (= W^T)
      attention    attT    : (M,  M)    (= block_diag(att, ..., att)^T)
      BN affine    scaleT, shiftT : (Fo, M)
    One GraphConvolution (out = att @ (y @ W) + b) becomes, transposed,
      outT = (wT @ yT) @ attT          (or attT first when the layer widens),
    i.e. exactly two full-width MXU matmuls per layer, no per-batch slicing.
    """
    x_ref = refs[0]
    out_ref = refs[-1]
    p = refs[1:-1]

    def gc(yT, wT_ref, attT_ref, scT_ref, shT_ref, tanh):
        wT = wT_ref[...]                                   # (Fo, Fi)
        attT = attT_ref[...]                               # (M, M)
        Fi = yT.shape[0]
        Fo = wT.shape[0]
        if Fi < Fo:
            # att first: smaller intermediate when the layer widens features.
            t = jnp.dot(yT, attT, preferred_element_type=jnp.float32)      # (Fi, M)
            outT = jnp.dot(wT, t, preferred_element_type=jnp.float32)      # (Fo, M)
        else:
            # W first: matches the reference association att @ (y @ W).
            t = jnp.dot(wT, yT, preferred_element_type=jnp.float32)        # (Fo, M)
            outT = jnp.dot(t, attT, preferred_element_type=jnp.float32)    # (Fo, M)
        if scT_ref is not None:
            outT = outT * scT_ref[...]                     # folded BN scale
        outT = outT + shT_ref[...]                         # folded BN shift (+ bias)
        if tanh:
            outT = jnp.tanh(outT)
        return outT

    xT = x_ref[...].astype(jnp.float32)                    # (Fin, M)

    # y = tanh(bn1(gc1(x)))
    y = gc(xT, p[0], p[1], p[2], p[3], tanh=True)

    # residual GC blocks (all activations stay in VMEM / vregs)
    off = 4
    for _ in range(num_stage):
        x_blk = y
        y = gc(y, p[off + 0], p[off + 1], p[off + 2], p[off + 3], tanh=True)
        y = gc(y, p[off + 4], p[off + 5], p[off + 6], p[off + 7], tanh=True)
        y = y + x_blk
        off += 8

    # y = gc7(y) + x   (bias only, no BN, no tanh)
    y = gc(y, p[off], p[off + 1], None, p[off + 2], tanh=False) + xT

    out_ref[...] = y.astype(out_ref.dtype)


def gcn_forward(params, x):
    """Full GCN forward in ONE pallas_call (all layers fused, VMEM-resident)."""
    B, N, Fin = x.shape
    M = B * N
    num_stage = len(params["blocks"])
    flat = _flatten_folded_params(params, B)

    # Lane-dense transposed input: xT[f, b*N + n] = x[b, n, f]  -> (Fin, M)
    xT = jnp.transpose(x, (2, 0, 1)).reshape(Fin, M).astype(jnp.float32)

    kernel = functools.partial(_fused_gcn_kernel, num_stage=num_stage)
    vmem_spec = pl.BlockSpec(memory_space=pltpu.MemorySpace.VMEM)
    outT = pl.pallas_call(
        kernel,
        out_shape=jax.ShapeDtypeStruct((Fin, M), jnp.float32),
        in_specs=[vmem_spec] * (1 + len(flat)),
        out_specs=vmem_spec,
    )(xT, *flat)

    # Back to the module's (B, N, Fin) layout (cheap host-side plumbing).
    return outT.reshape(Fin, B, N).transpose(1, 2, 0)


# ----------------------------------------------------------------------------
# Parameter construction (deterministic, mimicking the PyTorch init shapes)
# ----------------------------------------------------------------------------
def init_graph_conv(key, in_f, out_f, node_n):
    stdv = 1.0 / math.sqrt(out_f)
    kw, ka, kb = jax.random.split(key, 3)
    w = jax.random.uniform(kw, (in_f, out_f), jnp.float32, -stdv, stdv)
    att = jax.random.uniform(ka, (node_n, node_n), jnp.float32, -stdv, stdv)
    b = jax.random.uniform(kb, (out_f,), jnp.float32, -stdv, stdv)
    return {"w": w, "att": att, "b": b.reshape(1, out_f)}


def init_bn(key, node_n, feat, eps=1e-5):
    """BatchNorm1d(node_n*feat) folded (eval mode) into per-element scale/shift
    of shape (node_n, feat)."""
    kg, kb, km, kv = jax.random.split(key, 4)
    n = node_n * feat
    gamma = 1.0 + 0.1 * jax.random.uniform(kg, (n,), jnp.float32, -1.0, 1.0)
    beta = 0.1 * jax.random.uniform(kb, (n,), jnp.float32, -1.0, 1.0)
    rmean = 0.1 * jax.random.uniform(km, (n,), jnp.float32, -1.0, 1.0)
    rvar = 1.0 + 0.1 * jax.random.uniform(kv, (n,), jnp.float32, 0.0, 1.0)
    scale = gamma / jnp.sqrt(rvar + eps)
    shift = beta - rmean * scale
    return {"scale": scale.reshape(node_n, feat),
            "shift": shift.reshape(node_n, feat)}


def init_gcn_params(key, input_feature, hidden_feature, num_stage, node_n):
    keys = jax.random.split(key, 3 + 4 * num_stage)
    params = {
        "gc1": init_graph_conv(keys[0], input_feature, hidden_feature, node_n),
        "bn1": init_bn(keys[1], node_n, hidden_feature),
        "gc7": init_graph_conv(keys[2], hidden_feature, input_feature, node_n),
        "blocks": [],
    }
    for i in range(num_stage):
        k0, k1, k2, k3 = keys[3 + 4 * i: 7 + 4 * i]
        params["blocks"].append({
            "gc1": init_graph_conv(k0, hidden_feature, hidden_feature, node_n),
            "bn1": init_bn(k1, node_n, hidden_feature),
            "gc2": init_graph_conv(k2, hidden_feature, hidden_feature, node_n),
            "bn2": init_bn(k3, node_n, hidden_feature),
        })
    return params


# ----------------------------------------------------------------------------
# Host-side prep: fold bias into BN, block-diag the att, transpose everything
# ----------------------------------------------------------------------------
def _block_diag_att_T(att, B):
    """att_bd^T = kron(I_B, att^T) of shape (B*N, B*N)."""
    return jnp.kron(jnp.eye(B, dtype=jnp.float32), att.T)


def _fold_gc_bn_T(gc, bn, B):
    """Fold gc bias into the eval-mode BN affine and transpose to (Fo, M):
       scale*(out + b) + shift = scale*out + (scale*b + shift)."""
    scale = bn["scale"]                                   # (N, Fo)
    shift = bn["shift"] + scale * gc["b"]                 # (N, Fo)
    wT = gc["w"].T                                        # (Fo, Fi)
    attT = _block_diag_att_T(gc["att"], B)                # (M, M)
    scaleT = jnp.tile(scale, (B, 1)).T                    # (Fo, M)
    shiftT = jnp.tile(shift, (B, 1)).T                    # (Fo, M)
    return wT, attT, scaleT, shiftT


def _flatten_folded_params(params, B):
    flat = list(_fold_gc_bn_T(params["gc1"], params["bn1"], B))
    for blk in params["blocks"]:
        flat += list(_fold_gc_bn_T(blk["gc1"], blk["bn1"], B))
        flat += list(_fold_gc_bn_T(blk["gc2"], blk["bn2"], B))
    gc7 = params["gc7"]
    node_n = gc7["att"].shape[0]
    M = B * node_n
    flat += [gc7["w"].T,                                   # (Fin, H)
             _block_diag_att_T(gc7["att"], B),             # (M, M)
             jnp.tile(gc7["b"], (M, 1)).T]                 # (Fin, M) bias only
    return flat


# ----------------------------------------------------------------------------
# Pure-JAX reference (faithful to the PyTorch op order, for correctness check)
# ----------------------------------------------------------------------------
def _gc_ref(x, p, scale, shift, res, apply_tanh):
    out = jnp.einsum("nm,bmf->bnf", p["att"], x @ p["w"]) + p["b"][0]
    out = out * scale + shift
    if apply_tanh:
        out = jnp.tanh(out)
    return out + res


def gcn_ref(params, x):
    B, N, Fin = x.shape
    H = params["gc1"]["w"].shape[1]
    zeros_h = jnp.zeros((B, N, H), jnp.float32)
    y = _gc_ref(x, params["gc1"], params["bn1"]["scale"],
                params["bn1"]["shift"], zeros_h, True)
    for blk in params["blocks"]:
        x_blk = y
        y = _gc_ref(y, blk["gc1"], blk["bn1"]["scale"], blk["bn1"]["shift"],
                    zeros_h, True)
        y = _gc_ref(y, blk["gc2"], blk["bn2"]["scale"], blk["bn2"]["shift"],
                    x_blk, True)
    y = _gc_ref(y, params["gc7"], jnp.ones((N, Fin)), jnp.zeros((N, Fin)),
                x, False)
    return y


if __name__ == "__main__":
    B, NODE_N, IN_FEAT, HIDDEN, NUM_STAGE = 2, 48, 8, 32, 2

    key = jax.random.PRNGKey(0)
    k_params, k_x = jax.random.split(key)
    params = init_gcn_params(k_params, IN_FEAT, HIDDEN, NUM_STAGE, NODE_N)
    x = jax.random.normal(k_x, (B, NODE_N, IN_FEAT), jnp.float32)

    out = jax.block_until_ready(gcn_forward(params, x))
    ref = jax.block_until_ready(gcn_ref(params, x))

    assert out.shape == (B, NODE_N, IN_FEAT), out.shape
    assert jnp.allclose(out, ref, atol=1e-4, rtol=1e-4), float(
        jnp.max(jnp.abs(out - ref)))
    print("KERNEL_OK")
</pallas_src>

<mosaic_0001>
module attributes {stable_mosaic.version = 11 : i64} {
  func.func @_fused_gcn_kernel(%arg0: memref<8x96xf32, #tpu.memory_space<vmem>>, %arg1: memref<32x8xf32, #tpu.memory_space<vmem>>, %arg2: memref<96x96xf32, #tpu.memory_space<vmem>>, %arg3: memref<32x96xf32, #tpu.memory_space<vmem>>, %arg4: memref<32x96xf32, #tpu.memory_space<vmem>>, %arg5: memref<32x32xf32, #tpu.memory_space<vmem>>, %arg6: memref<96x96xf32, #tpu.memory_space<vmem>>, %arg7: memref<32x96xf32, #tpu.memory_space<vmem>>, %arg8: memref<32x96xf32, #tpu.memory_space<vmem>>, %arg9: memref<32x32xf32, #tpu.memory_space<vmem>>, %arg10: memref<96x96xf32, #tpu.memory_space<vmem>>, %arg11: memref<32x96xf32, #tpu.memory_space<vmem>>, %arg12: memref<32x96xf32, #tpu.memory_space<vmem>>, %arg13: memref<32x32xf32, #tpu.memory_space<vmem>>, %arg14: memref<96x96xf32, #tpu.memory_space<vmem>>, %arg15: memref<32x96xf32, #tpu.memory_space<vmem>>, %arg16: memref<32x96xf32, #tpu.memory_space<vmem>>, %arg17: memref<32x32xf32, #tpu.memory_space<vmem>>, %arg18: memref<96x96xf32, #tpu.memory_space<vmem>>, %arg19: memref<32x96xf32, #tpu.memory_space<vmem>>, %arg20: memref<32x96xf32, #tpu.memory_space<vmem>>, %arg21: memref<8x32xf32, #tpu.memory_space<vmem>>, %arg22: memref<96x96xf32, #tpu.memory_space<vmem>>, %arg23: memref<8x96xf32, #tpu.memory_space<vmem>>, %arg24: memref<8x96xf32, #tpu.memory_space<vmem>>) attributes {dimension_semantics = [], scalar_prefetch = 0 : i64, scratch_operands = 0 : i64, tpu.core_type = #tpu.core_type<tc>} {
    %c0 = arith.constant 0 : index
    %c0_0 = arith.constant 0 : index
    %0 = vector.load %arg0[%c0, %c0_0] : memref<8x96xf32, #tpu.memory_space<vmem>>, vector<8x96xf32>
    %c0_1 = arith.constant 0 : index
    %c0_2 = arith.constant 0 : index
    %1 = vector.load %arg1[%c0_1, %c0_2] : memref<32x8xf32, #tpu.memory_space<vmem>>, vector<32x8xf32>
    %c0_3 = arith.constant 0 : index
    %c0_4 = arith.constant 0 : index
    %2 = vector.load %arg2[%c0_3, %c0_4] : memref<96x96xf32, #tpu.memory_space<vmem>>, vector<96x96xf32>
    %cst = arith.constant dense<0.000000e+00> : vector<8x96xf32>
    %3 = tpu.matmul %0, %2, %cst {dimension_numbers = #tpu.dot_dimension_numbers<[1], [0], [0], [1], [0, 0, 1, 1], [], []>} : vector<8x96xf32>, vector<96x96xf32>, vector<8x96xf32> -> vector<8x96xf32>
    %cst_5 = arith.constant dense<0.000000e+00> : vector<32x96xf32>
    %4 = tpu.matmul %1, %3, %cst_5 {dimension_numbers = #tpu.dot_dimension_numbers<[1], [0], [0], [1], [0, 0, 1, 1], [], []>} : vector<32x8xf32>, vector<8x96xf32>, vector<32x96xf32> -> vector<32x96xf32>
    %c0_6 = arith.constant 0 : index
    %c0_7 = arith.constant 0 : index
    %5 = vector.load %arg3[%c0_6, %c0_7] : memref<32x96xf32, #tpu.memory_space<vmem>>, vector<32x96xf32>
    %6 = arith.mulf %4, %5 : vector<32x96xf32>
    %c0_8 = arith.constant 0 : index
    %c0_9 = arith.constant 0 : index
    %7 = vector.load %arg4[%c0_8, %c0_9] : memref<32x96xf32, #tpu.memory_space<vmem>>, vector<32x96xf32>
    %8 = arith.addf %6, %7 : vector<32x96xf32>
    %9 = math.tanh %8 : vector<32x96xf32>
    %c0_10 = arith.constant 0 : index
    %c0_11 = arith.constant 0 : index
    %10 = vector.load %arg5[%c0_10, %c0_11] : memref<32x32xf32, #tpu.memory_space<vmem>>, vector<32x32xf32>
    %c0_12 = arith.constant 0 : index
    %c0_13 = arith.constant 0 : index
    %11 = vector.load %arg6[%c0_12, %c0_13] : memref<96x96xf32, #tpu.memory_space<vmem>>, vector<96x96xf32>
    %cst_14 = arith.constant dense<0.000000e+00> : vector<32x96xf32>
    %12 = tpu.matmul %10, %9, %cst_14 {dimension_numbers = #tpu.dot_dimension_numbers<[1], [0], [0], [1], [0, 0, 1, 1], [], []>} : vector<32x32xf32>, vector<32x96xf32>, vector<32x96xf32> -> vector<32x96xf32>
    %cst_15 = arith.constant dense<0.000000e+00> : vector<32x96xf32>
    %13 = tpu.matmul %12, %11, %cst_15 {dimension_numbers = #tpu.dot_dimension_numbers<[1], [0], [0], [1], [0, 0, 1, 1], [], []>} : vector<32x96xf32>, vector<96x96xf32>, vector<32x96xf32> -> vector<32x96xf32>
    %c0_16 = arith.constant 0 : index
    %c0_17 = arith.constant 0 : index
    %14 = vector.load %arg7[%c0_16, %c0_17] : memref<32x96xf32, #tpu.memory_space<vmem>>, vector<32x96xf32>
    %15 = arith.mulf %13, %14 : vector<32x96xf32>
    %c0_18 = arith.constant 0 : index
    %c0_19 = arith.constant 0 : index
    %16 = vector.load %arg8[%c0_18, %c0_19] : memref<32x96xf32, #tpu.memory_space<vmem>>, vector<32x96xf32>
    %17 = arith.addf %15, %16 : vector<32x96xf32>
    %18 = math.tanh %17 : vector<32x96xf32>
    %c0_20 = arith.constant 0 : index
    %c0_21 = arith.constant 0 : index
    %19 = vector.load %arg9[%c0_20, %c0_21] : memref<32x32xf32, #tpu.memory_space<vmem>>, vector<32x32xf32>
    %c0_22 = arith.constant 0 : index
    %c0_23 = arith.constant 0 : index
    %20 = vector.load %arg10[%c0_22, %c0_23] : memref<96x96xf32, #tpu.memory_space<vmem>>, vector<96x96xf32>
    %cst_24 = arith.constant dense<0.000000e+00> : vector<32x96xf32>
    %21 = tpu.matmul %19, %18, %cst_24 {dimension_numbers = #tpu.dot_dimension_numbers<[1], [0], [0], [1], [0, 0, 1, 1], [], []>} : vector<32x32xf32>, vector<32x96xf32>, vector<32x96xf32> -> vector<32x96xf32>
    %cst_25 = arith.constant dense<0.000000e+00> : vector<32x96xf32>
    %22 = tpu.matmul %21, %20, %cst_25 {dimension_numbers = #tpu.dot_dimension_numbers<[1], [0], [0], [1], [0, 0, 1, 1], [], []>} : vector<32x96xf32>, vector<96x96xf32>, vector<32x96xf32> -> vector<32x96xf32>
    %c0_26 = arith.constant 0 : index
    %c0_27 = arith.constant 0 : index
    %23 = vector.load %arg11[%c0_26, %c0_27] : memref<32x96xf32, #tpu.memory_space<vmem>>, vector<32x96xf32>
    %24 = arith.mulf %22, %23 : vector<32x96xf32>
    %c0_28 = arith.constant 0 : index
    %c0_29 = arith.constant 0 : index
    %25 = vector.load %arg12[%c0_28, %c0_29] : memref<32x96xf32, #tpu.memory_space<vmem>>, vector<32x96xf32>
    %26 = arith.addf %24, %25 : vector<32x96xf32>
    %27 = math.tanh %26 : vector<32x96xf32>
    %28 = arith.addf %27, %9 : vector<32x96xf32>
    %c0_30 = arith.constant 0 : index
    %c0_31 = arith.constant 0 : index
    %29 = vector.load %arg13[%c0_30, %c0_31] : memref<32x32xf32, #tpu.memory_space<vmem>>, vector<32x32xf32>
    %c0_32 = arith.constant 0 : index
    %c0_33 = arith.constant 0 : index
    %30 = vector.load %arg14[%c0_32, %c0_33] : memref<96x96xf32, #tpu.memory_space<vmem>>, vector<96x96xf32>
    %cst_34 = arith.constant dense<0.000000e+00> : vector<32x96xf32>
    %31 = tpu.matmul %29, %28, %cst_34 {dimension_numbers = #tpu.dot_dimension_numbers<[1], [0], [0], [1], [0, 0, 1, 1], [], []>} : vector<32x32xf32>, vector<32x96xf32>, vector<32x96xf32> -> vector<32x96xf32>
    %cst_35 = arith.constant dense<0.000000e+00> : vector<32x96xf32>
    %32 = tpu.matmul %31, %30, %cst_35 {dimension_numbers = #tpu.dot_dimension_numbers<[1], [0], [0], [1], [0, 0, 1, 1], [], []>} : vector<32x96xf32>, vector<96x96xf32>, vector<32x96xf32> -> vector<32x96xf32>
    %c0_36 = arith.constant 0 : index
    %c0_37 = arith.constant 0 : index
    %33 = vector.load %arg15[%c0_36, %c0_37] : memref<32x96xf32, #tpu.memory_space<vmem>>, vector<32x96xf32>
    %34 = arith.mulf %32, %33 : vector<32x96xf32>
    %c0_38 = arith.constant 0 : index
    %c0_39 = arith.constant 0 : index
    %35 = vector.load %arg16[%c0_38, %c0_39] : memref<32x96xf32, #tpu.memory_space<vmem>>, vector<32x96xf32>
    %36 = arith.addf %34, %35 : vector<32x96xf32>
    %37 = math.tanh %36 : vector<32x96xf32>
    %c0_40 = arith.constant 0 : index
    %c0_41 = arith.constant 0 : index
    %38 = vector.load %arg17[%c0_40, %c0_41] : memref<32x32xf32, #tpu.memory_space<vmem>>, vector<32x32xf32>
    %c0_42 = arith.constant 0 : index
    %c0_43 = arith.constant 0 : index
    %39 = vector.load %arg18[%c0_42, %c0_43] : memref<96x96xf32, #tpu.memory_space<vmem>>, vector<96x96xf32>
    %cst_44 = arith.constant dense<0.000000e+00> : vector<32x96xf32>
    %40 = tpu.matmul %38, %37, %cst_44 {dimension_numbers = #tpu.dot_dimension_numbers<[1], [0], [0], [1], [0, 0, 1, 1], [], []>} : vector<32x32xf32>, vector<32x96xf32>, vector<32x96xf32> -> vector<32x96xf32>
    %cst_45 = arith.constant dense<0.000000e+00> : vector<32x96xf32>
    %41 = tpu.matmul %40, %39, %cst_45 {dimension_numbers = #tpu.dot_dimension_numbers<[1], [0], [0], [1], [0, 0, 1, 1], [], []>} : vector<32x96xf32>, vector<96x96xf32>, vector<32x96xf32> -> vector<32x96xf32>
    %c0_46 = arith.constant 0 : index
    %c0_47 = arith.constant 0 : index
    %42 = vector.load %arg19[%c0_46, %c0_47] : memref<32x96xf32, #tpu.memory_space<vmem>>, vector<32x96xf32>
    %43 = arith.mulf %41, %42 : vector<32x96xf32>
    %c0_48 = arith.constant 0 : index
    %c0_49 = arith.constant 0 : index
    %44 = vector.load %arg20[%c0_48, %c0_49] : memref<32x96xf32, #tpu.memory_space<vmem>>, vector<32x96xf32>
    %45 = arith.addf %43, %44 : vector<32x96xf32>
    %46 = math.tanh %45 : vector<32x96xf32>
    %47 = arith.addf %46, %28 : vector<32x96xf32>
    %c0_50 = arith.constant 0 : index
    %c0_51 = arith.constant 0 : index
    %48 = vector.load %arg21[%c0_50, %c0_51] : memref<8x32xf32, #tpu.memory_space<vmem>>, vector<8x32xf32>
    %c0_52 = arith.constant 0 : index
    %c0_53 = arith.constant 0 : index
    %49 = vector.load %arg22[%c0_52, %c0_53] : memref<96x96xf32, #tpu.memory_space<vmem>>, vector<96x96xf32>
    %cst_54 = arith.constant dense<0.000000e+00> : vector<8x96xf32>
    %50 = tpu.matmul %48, %47, %cst_54 {dimension_numbers = #tpu.dot_dimension_numbers<[1], [0], [0], [1], [0, 0, 1, 1], [], []>} : vector<8x32xf32>, vector<32x96xf32>, vector<8x96xf32> -> vector<8x96xf32>
    %cst_55 = arith.constant dense<0.000000e+00> : vector<8x96xf32>
    %51 = tpu.matmul %50, %49, %cst_55 {dimension_numbers = #tpu.dot_dimension_numbers<[1], [0], [0], [1], [0, 0, 1, 1], [], []>} : vector<8x96xf32>, vector<96x96xf32>, vector<8x96xf32> -> vector<8x96xf32>
    %c0_56 = arith.constant 0 : index
    %c0_57 = arith.constant 0 : index
    %52 = vector.load %arg23[%c0_56, %c0_57] : memref<8x96xf32, #tpu.memory_space<vmem>>, vector<8x96xf32>
    %53 = arith.addf %51, %52 : vector<8x96xf32>
    %54 = arith.addf %53, %0 : vector<8x96xf32>
    %c0_58 = arith.constant 0 : index
    %c0_59 = arith.constant 0 : index
    %55 = vector.load %arg24[%c0_58, %c0_59] : memref<8x96xf32, #tpu.memory_space<vmem>>, vector<8x96xf32>
    tpu.vector_store %arg24[%c0_58, %c0_59], %54 {strides = array<i32>} : memref<8x96xf32, #tpu.memory_space<vmem>>, vector<8x96xf32>,
    return
  }
}

</mosaic_0001>

<bundles_post_ra>
// kernel: tpu_custom_call.1
= control target key start
LH: loop header
LB: loop body
LE: loop exit
PB: predicated region body
PF: predicated region fallthrough
CT: control target
= control target key end

     0   :  { %s2982_s0 = inlined_call_operand.hbm [shape: f32[8,96], index: 0, kind: input, shape index: {}]   ;;  %s2983_s1 = inlined_call_operand.vmem [shape: f32[32,8], index: 1, kind: input, shape index: {}]   ;;  %s2984_s2 = inlined_call_operand.hbm [shape: f32[96,96], index: 2, kind: input, shape index: {}]   ;;  %s2985_s3 = inlined_call_operand.vmem [shape: f32[32,96], index: 3, kind: input, shape index: {}]   ;;  %s2986_s4 = inlined_call_operand.hbm [shape: f32[32,96], index: 4, kind: input, shape index: {}]   ;;  %s2987_s5 = inlined_call_operand.hbm [shape: f32[32,32], index: 5, kind: input, shape index: {}]   ;;  %s2988_s6 = inlined_call_operand.hbm [shape: f32[96,96], index: 6, kind: input, shape index: {}]   ;;  %s2989_s7 = inlined_call_operand.hbm [shape: f32[32,96], index: 7, kind: input, shape index: {}]   ;;  %s2990_s8 = inlined_call_operand.hbm [shape: f32[32,96], index: 8, kind: input, shape index: {}]   ;;  %s2991_s9 = inlined_call_operand.hbm [shape: f32[32,32], index: 9, kind: input, shape index: {}]   ;;  %s2992_s10 = inlined_call_operand.hbm [shape: f32[96,96], index: 10, kind: input, shape index: {}]   ;;  %s2993_s11 = inlined_call_operand.hbm [shape: f32[32,96], index: 11, kind: input, shape index: {}]   ;;  %s2994_s12 = inlined_call_operand.hbm [shape: f32[32,96], index: 12, kind: input, shape index: {}]   ;;  %s2995_s13 = inlined_call_operand.hbm [shape: f32[32,32], index: 13, kind: input, shape index: {}]   ;;  %s2996_s14 = inlined_call_operand.hbm [shape: f32[96,96], index: 14, kind: input, shape index: {}]   ;;  %s2997_s15 = inlined_call_operand.vmem [shape: f32[32,96], index: 15, kind: input, shape index: {}]   ;;  %s2998_s16 = inlined_call_operand.hbm [shape: f32[32,96], index: 16, kind: input, shape index: {}]   ;;  %s2999_s17 = inlined_call_operand.hbm [shape: f32[32,32], index: 17, kind: input, shape index: {}]   ;;  %s3000_s18 = inlined_call_operand.hbm [shape: f32[96,96], index: 18, kind: input, shape index: {}]   ;;  %s3001_s19 = inlined_call_operand.hbm [shape: f32[32,96], index: 19, kind: input, shape index: {}]   ;;  %s3002_s20 = inlined_call_operand.hbm [shape: f32[32,96], index: 20, kind: input, shape index: {}]   ;;  %s3003_s21 = inlined_call_operand.vmem [shape: f32[8,32], index: 21, kind: input, shape index: {}]   ;;  %s3004_s22 = inlined_call_operand.hbm [shape: f32[96,96], index: 22, kind: input, shape index: {}]   ;;  %s3005_s23 = inlined_call_operand.vmem [shape: f32[8,96], index: 23, kind: input, shape index: {}]   ;;  %s3006_s24 = inlined_call_operand.hbm [shape: f32[8,96], index: 24, kind: output, shape index: {}]  }
   0x1   :  { %3009 = sst [smem:[#allocation44_spill]] %s2982_s0 }
   0x2   :  { %3010 = sst [smem:[#allocation45_spill]] %s2983_s1 }
   0x3   :  { %3011 = sst [smem:[#allocation46_spill]] %s2984_s2 }
   0x4   :  { %3012 = sst [smem:[#allocation47_spill]] %s2985_s3 }
   0x5   :  { %3013 = sst [smem:[#allocation48_spill]] %s2986_s4 }
   0x6   :  { %3014 = sst [smem:[#allocation49_spill]] %s2987_s5 }
   0x7   :  { %3015 = sst [smem:[#allocation50_spill]] %s2988_s6 }
   0x8   :  { %3016 = sst [smem:[#allocation51_spill]] %s2989_s7 }
   0x9   :  { %3017 = sst [smem:[#allocation52_spill]] %s2990_s8 }
   0xa   :  { %29 = vsyncpa [#allocation3], 0 }
   0xb   :  { %30 = vsyncpa [#allocation6], 0 }
   0xc   :  { %31 = vsyncpa [#allocation9], 0 }
   0xd   :  { %32 = vsyncpa [#allocation12], 0 }
   0xe   :  { %33 = vsyncpa [#allocation15], 0 }
   0xf   :  { %34 = vsyncpa [#allocation18], 0 }
  0x10   :  { %35 = vsyncpa [#allocation21], 0 }
  0x11   :  { %36 = vsyncpa [#allocation24], 0 }
  0x12   :  { %37 = vsyncpa [#allocation27], 0 }
  0x13   :  { %38 = vsyncpa [#allocation30], 0 }
  0x14   :  { %39 = vsyncpa [#allocation4], 0  ;;  %s2563_s5 = smov [#allocation5]  }
  0x15   :  { %s57_s26 = sshll.u32 %s2563_s5, 4  ;;  %s58_s26 = int_to_ptr.vmem [resolvable:$true] %s57_s26 }
  0x16   :  { %s2149_s27 = scalar_lea.vmem %s58_s26, 1536  ;;  %p2154_p1 = scmp.lt.s32.totalorder %s58_s26, %s58_s26 }
  0x17   :  { %p2150_p0 = scmp.ne.s32.totalorder %s58_s26, %s2149_s27  ;;  %p2155_p2 = scmp.lt.s32.totalorder %s2149_s27, %s2149_s27 }
  0x19   :  { %p2156_p3 = por %p2155_p2, %p2154_p1 }
  0x1b   :  { %p2157_p4 = pnand %p2156_p3, %p2150_p0 }
  0x1d   :  { %2160 = shalt.err (!%p2157_p4)
}
  0x1e   :  { %s2564_s28 = smov 128   ;;  %s2565_s6 = smov 8  }
  0x1f   :  { %s3018_s0 = sld [smem:[#allocation46_spill]]  ;;  %s2566_s7 = smov [#allocation8]  }
  0x20   :  { %s83_s30 = sshll.u32 %s2566_s7, 4  ;;  %s2567_s3 = smov [#allocation11]   ;;  %s84_s30 = int_to_ptr.vmem [resolvable:$true] %s83_s30 }
  0x21   :  { %s107_s25 = sshll.u32 %s2567_s3, 4  ;;  %s2169_s8 = scalar_lea.vmem %s84_s30, 512  ;;  %s108_s25 = int_to_ptr.vmem [resolvable:$true] %s107_s25 }
  0x22   :  { %p2170_p5 = scmp.ne.s32.totalorder %s84_s30, %s2169_s8  ;;  %p2174_p6 = scmp.lt.s32.totalorder %s84_s30, %s84_s30 }
  0x23   :  { %p2175_p7 = scmp.lt.s32.totalorder %s2169_s8, %s2169_s8 }
  0x25   :  { %63 = dma.hbm_to_vmem [thread:$0]  %s3018_s0, 1536, %s58_s26, [#allocation6], %s2564_s28, %s2564_s28, %s2565_s6  }
  0x26   :  { %p2176_p8 = por %p2175_p7, %p2174_p6 }
  0x28   :  { %p2177_p9 = pnand %p2176_p8, %p2170_p5 }
  0x2a   :  { %2180 = shalt.err (!%p2177_p9)
}
  0x2b   :  { %s3019_s5 = sld [smem:[#allocation49_spill]]  ;;  %s2189_s26 = scalar_lea.vmem %s108_s25, 512 }
  0x2c   :  { %p2190_p10 = scmp.ne.s32.totalorder %s108_s25, %s2189_s26  ;;  %p2194_p11 = scmp.lt.s32.totalorder %s108_s25, %s108_s25 }
  0x2d   :  { %p2195_p12 = scmp.lt.s32.totalorder %s2189_s26, %s2189_s26 }
  0x2f   :  { %p2196_p13 = por %p2195_p12, %p2194_p11 }
  0x31   :  { %89 = dma.hbm_to_vmem [thread:$0]  %s3019_s5, 512, %s84_s30, [#allocation9], %s2564_s28, %s2564_s28, %s2565_s6  }
  0x32   :  { %p2197_p0 = pnand %p2196_p13, %p2190_p10 }
  0x34   :  { %2200 = shalt.err (!%p2197_p0)
}
  0x35   :  { %s3020_s29 = sld [smem:[#allocation51_spill]]  ;;  %s2568_s0 = smov [#allocation14]  }
  0x36   :  { %s131_s7 = sshll.u32 %s2568_s0, 4  ;;  %s2569_s3 = smov [#allocation17]   ;;  %s132_s7 = int_to_ptr.vmem [resolvable:$true] %s131_s7 }
  0x37   :  { %s155_s30 = sshll.u32 %s2569_s3, 4  ;;  %s2209_s8 = scalar_lea.vmem %s132_s7, 512  ;;  %s156_s30 = int_to_ptr.vmem [resolvable:$true] %s155_s30 }
  0x38   :  { %p2210_p1 = scmp.ne.s32.totalorder %s132_s7, %s2209_s8  ;;  %p2214_p2 = scmp.lt.s32.totalorder %s132_s7, %s132_s7 }
  0x39   :  { %p2215_p3 = scmp.lt.s32.totalorder %s2209_s8, %s2209_s8 }
  0x3b   :  { %113 = dma.hbm_to_vmem [thread:$0]  %s3020_s29, 512, %s108_s25, [#allocation12], %s2564_s28, %s2564_s28, %s2565_s6  }
  0x3c   :  { %p2216_p4 = por %p2215_p3, %p2214_p2 }
  0x3e   :  { %p2217_p5 = pnand %p2216_p4, %p2210_p1 }
  0x40   :  { %2220 = shalt.err (!%p2217_p5)
}
  0x41   :  { %137 = dma.hbm_to_vmem [thread:$0]  %s2991_s9, 512, %s132_s7, [#allocation15], %s2564_s28, %s2564_s28, %s2565_s6  }
  0x42   :  { %s2229_s25 = scalar_lea.vmem %s156_s30, 512  ;;  %p2234_p7 = scmp.lt.s32.totalorder %s156_s30, %s156_s30 }
  0x43   :  { %p2230_p6 = scmp.ne.s32.totalorder %s156_s30, %s2229_s25  ;;  %p2235_p8 = scmp.lt.s32.totalorder %s2229_s25, %s2229_s25 }
  0x45   :  { %p2236_p9 = por %p2235_p8, %p2234_p7 }
  0x47   :  { %p2237_p10 = pnand %p2236_p9, %p2230_p6 }
  0x49   :  { %2240 = shalt.err (!%p2237_p10)
}
  0x4a   :  { %161 = dma.hbm_to_vmem [thread:$0]  %s2993_s11, 512, %s156_s30, [#allocation18], %s2564_s28, %s2564_s28, %s2565_s6  }
  0x4b   :  { %s2570_s27 = smov [#allocation20]   ;;  %s2571_s29 = smov [#allocation23]  }
  0x4c   :  { %s179_s2 = sshll.u32 %s2570_s27, 4  ;;  %s205_s9 = sshll.u32 %s2571_s29, 4  ;;  %s180_s2 = int_to_ptr.vmem [resolvable:$true] %s179_s2  ;;  %s206_s9 = int_to_ptr.vmem [resolvable:$true] %s205_s9 }
  0x4d   :  { %s2249_s0 = scalar_lea.vmem %s180_s2, 512  ;;  %p2254_p12 = scmp.lt.s32.totalorder %s180_s2, %s180_s2 }
  0x4e   :  { %p2250_p11 = scmp.ne.s32.totalorder %s180_s2, %s2249_s0  ;;  %p2255_p13 = scmp.lt.s32.totalorder %s2249_s0, %s2249_s0 }
  0x50   :  { %p2256_p0 = por %p2255_p13, %p2254_p12 }
  0x52   :  { %p2257_p1 = pnand %p2256_p0, %p2250_p11 }
  0x54   :  { %2260 = shalt.err (!%p2257_p1)
}
  0x55   :  { %185 = dma.hbm_to_vmem [thread:$0]  %s2995_s13, 512, %s180_s2, [#allocation21], %s2564_s28, %s2564_s28, %s2565_s6  }
  0x56   :  { %s2269_s11 = scalar_lea.vmem %s206_s9, 512  ;;  %p2274_p3 = scmp.lt.s32.totalorder %s206_s9, %s206_s9 }
  0x57   :  { %p2270_p2 = scmp.ne.s32.totalorder %s206_s9, %s2269_s11  ;;  %p2275_p4 = scmp.lt.s32.totalorder %s2269_s11, %s2269_s11 }
  0x59   :  { %p2276_p5 = por %p2275_p4, %p2274_p3 }
  0x5b   :  { %p2277_p6 = pnand %p2276_p5, %p2270_p2 }
  0x5d   :  { %2280 = shalt.err (!%p2277_p6)
}
  0x5e   :  { %211 = dma.hbm_to_vmem [thread:$0]  %s2998_s16, 512, %s206_s9, [#allocation24], %s2564_s28, %s2564_s28, %s2565_s6  }
  0x5f   :  { %s2572_s4 = smov [#allocation26]   ;;  %s2573_s25 = smov [#allocation29]  }
  0x60   :  { %s229_s1 = sshll.u32 %s2572_s4, 4  ;;  %s253_s13 = sshll.u32 %s2573_s25, 4  ;;  %s230_s1 = int_to_ptr.vmem [resolvable:$true] %s229_s1  ;;  %s254_s13 = int_to_ptr.vmem [resolvable:$true] %s253_s13 }
  0x61   :  { %s2289_s5 = scalar_lea.vmem %s230_s1, 1536  ;;  %p2294_p8 = scmp.lt.s32.totalorder %s230_s1, %s230_s1 }
  0x62   :  { %p2290_p7 = scmp.ne.s32.totalorder %s230_s1, %s2289_s5  ;;  %p2295_p9 = scmp.lt.s32.totalorder %s2289_s5, %s2289_s5 }
  0x64   :  { %p2296_p10 = por %p2295_p9, %p2294_p8 }
  0x66   :  { %p2297_p11 = pnand %p2296_p10, %p2290_p7 }
  0x68   :  { %2300 = shalt.err (!%p2297_p11)
}
  0x69   :  { %235 = dma.hbm_to_vmem [thread:$0]  %s3000_s18, 1536, %s230_s1, [#allocation27], %s2564_s28, %s2564_s28, %s2565_s6  }
  0x6a   :  { %s2309_s16 = scalar_lea.vmem %s254_s13, 512  ;;  %p2314_p13 = scmp.lt.s32.totalorder %s254_s13, %s254_s13 }
  0x6b   :  { %p2310_p12 = scmp.ne.s32.totalorder %s254_s13, %s2309_s16  ;;  %p2315_p0 = scmp.lt.s32.totalorder %s2309_s16, %s2309_s16 }
  0x6d   :  { %p2316_p1 = por %p2315_p0, %p2314_p13 }
  0x6f   :  { %p2317_p2 = pnand %p2316_p1, %p2310_p12 }
  0x71   :  { %2320 = shalt.err (!%p2317_p2)
}
  0x72   :  { %259 = dma.hbm_to_vmem [thread:$0]  %s3002_s20, 512, %s254_s13, [#allocation30], %s2564_s28, %s2564_s28, %s2565_s6  }
  0x73   :  { %s2574_s9 = smov [#allocation2]   ;;  %s2575_s7 = smov [#allocation7]  }
  0x74   :  { %s46_s0 = sshll.u32 %s2574_s9, 4  ;;  %s71_s18 = sshll.u32 %s2575_s7, 4  ;;  %s47_s0 = int_to_ptr.vmem [resolvable:$true] %s46_s0  ;;  %s72_s18 = int_to_ptr.vmem [resolvable:$true] %s71_s18 }
  0x75   :  { %s2329_s3 = scalar_lea.vmem %s47_s0, 128  ;;  %p2334_p4 = scmp.lt.s32.totalorder %s47_s0, %s47_s0 }
  0x76   :  { %p2330_p3 = scmp.ne.s32.totalorder %s47_s0, %s2329_s3  ;;  %p2335_p5 = scmp.lt.s32.totalorder %s2329_s3, %s2329_s3 }
  0x78   :  { %p2336_p6 = por %p2335_p5, %p2334_p4 }
  0x7a   :  { %p2337_p7 = pnand %p2336_p6, %p2330_p3 }
  0x7c   :  { %2340 = shalt.err (!%p2337_p7)
}
  0x7d   :  { %s3021_s8 = sld [smem:[#allocation44_spill]]  ;;  %s2349_s4 = scalar_lea.vmem %s72_s18, 512 }
  0x7e   :  { %p2350_p8 = scmp.ne.s32.totalorder %s72_s18, %s2349_s4  ;;  %p2354_p9 = scmp.lt.s32.totalorder %s72_s18, %s72_s18 }
  0x7f   :  { %p2355_p10 = scmp.lt.s32.totalorder %s2349_s4, %s2349_s4 }
  0x81   :  { %p2356_p11 = por %p2355_p10, %p2354_p9 }
  0x83   :  { %49 = dma.hbm_to_vmem [thread:$0]  %s3021_s8, 128, %s47_s0, [#allocation3]  }
  0x84   :  { %p2357_p12 = pnand %p2356_p11, %p2350_p8 }
  0x86   :  { %2360 = shalt.err (!%p2357_p12)
}
  0x87   :  { %s3022_s25 = sld [smem:[#allocation48_spill]]  ;;  %s2576_s13 = smov [#allocation10]  }
  0x88   :  { %s95_s5 = sshll.u32 %s2576_s13, 4  ;;  %s2577_s26 = smov [#allocation13]   ;;  %s96_s5 = int_to_ptr.vmem [resolvable:$true] %s95_s5 }
  0x89   :  { %s119_s27 = sshll.u32 %s2577_s26, 4  ;;  %s2369_s16 = scalar_lea.vmem %s96_s5, 1536  ;;  %s120_s27 = int_to_ptr.vmem [resolvable:$true] %s119_s27 }
  0x8a   :  { %p2370_p13 = scmp.ne.s32.totalorder %s96_s5, %s2369_s16  ;;  %p2374_p0 = scmp.lt.s32.totalorder %s96_s5, %s96_s5 }
  0x8b   :  { %p2375_p1 = scmp.lt.s32.totalorder %s2369_s16, %s2369_s16 }
  0x8d   :  { %77 = dma.hbm_to_vmem [thread:$0]  %s3022_s25, 512, %s72_s18, [#allocation6], %s2564_s28, %s2564_s28, %s2565_s6  }
  0x8e   :  { %p2376_p2 = por %p2375_p1, %p2374_p0 }
  0x90   :  { %p2377_p3 = pnand %p2376_p2, %p2370_p13 }
  0x92   :  { %2380 = shalt.err (!%p2377_p3)
}
  0x93   :  { %s3023_s9 = sld [smem:[#allocation50_spill]]  ;;  %s2389_s0 = scalar_lea.vmem %s120_s27, 512 }
  0x94   :  { %p2390_p4 = scmp.ne.s32.totalorder %s120_s27, %s2389_s0  ;;  %p2394_p5 = scmp.lt.s32.totalorder %s120_s27, %s120_s27 }
  0x95   :  { %p2395_p6 = scmp.lt.s32.totalorder %s2389_s0, %s2389_s0 }
  0x97   :  { %p2396_p7 = por %p2395_p6, %p2394_p5 }
  0x99   :  { %101 = dma.hbm_to_vmem [thread:$0]  %s3023_s9, 1536, %s96_s5, [#allocation9], %s2564_s28, %s2564_s28, %s2565_s6  }
  0x9a   :  { %p2397_p8 = pnand %p2396_p7, %p2390_p4 }
  0x9c   :  { %2400 = shalt.err (!%p2397_p8)
}
  0x9d   :  { %s3024_s3 = sld [smem:[#allocation52_spill]]  ;;  %s2578_s11 = smov [#allocation16]  }
  0x9e   :  { %s143_s30 = sshll.u32 %s2578_s11, 4  ;;  %s2579_s8 = smov [#allocation19]   ;;  %s144_s30 = int_to_ptr.vmem [resolvable:$true] %s143_s30 }
  0x9f   :  { %s167_s4 = sshll.u32 %s2579_s8, 4  ;;  %s2409_s20 = scalar_lea.vmem %s144_s30, 1536  ;;  %s168_s4 = int_to_ptr.vmem [resolvable:$true] %s167_s4 }
  0xa0   :  { %p2410_p9 = scmp.ne.s32.totalorder %s144_s30, %s2409_s20  ;;  %p2414_p10 = scmp.lt.s32.totalorder %s144_s30, %s144_s30 }
  0xa1   :  { %p2415_p11 = scmp.lt.s32.totalorder %s2409_s20, %s2409_s20 }
  0xa3   :  { %125 = dma.hbm_to_vmem [thread:$0]  %s3024_s3, 512, %s120_s27, [#allocation12], %s2564_s28, %s2564_s28, %s2565_s6  }
  0xa4   :  { %p2416_p12 = por %p2415_p11, %p2414_p10 }
  0xa6   :  { %p2417_p13 = pnand %p2416_p12, %p2410_p9 }
  0xa8   :  { %2420 = shalt.err (!%p2417_p13)
}
  0xa9   :  { %149 = dma.hbm_to_vmem [thread:$0]  %s2992_s10, 1536, %s144_s30, [#allocation15], %s2564_s28, %s2564_s28, %s2565_s6  }
  0xaa   :  { %s2429_s13 = scalar_lea.vmem %s168_s4, 512  ;;  %p2434_p1 = scmp.lt.s32.totalorder %s168_s4, %s168_s4 }
  0xab   :  { %p2430_p0 = scmp.ne.s32.totalorder %s168_s4, %s2429_s13  ;;  %p2435_p2 = scmp.lt.s32.totalorder %s2429_s13, %s2429_s13 }
  0xad   :  { %p2436_p3 = por %p2435_p2, %p2434_p1 }
  0xaf   :  { %p2437_p4 = pnand %p2436_p3, %p2430_p0 }
  0xb1   :  { %2440 = shalt.err (!%p2437_p4)
}
  0xb2   :  { %173 = dma.hbm_to_vmem [thread:$0]  %s2994_s12, 512, %s168_s4, [#allocation18], %s2564_s28, %s2564_s28, %s2565_s6  }
  0xb3   :  { %s2580_s27 = smov [#allocation22]   ;;  %s2581_s2 = smov [#allocation25]  }
  0xb4   :  { %s191_s16 = sshll.u32 %s2580_s27, 4  ;;  %s217_s10 = sshll.u32 %s2581_s2, 4  ;;  %s192_s16 = int_to_ptr.vmem [resolvable:$true] %s191_s16  ;;  %s218_s10 = int_to_ptr.vmem [resolvable:$true] %s217_s10 }
  0xb5   :  { %s2449_s29 = scalar_lea.vmem %s192_s16, 1536  ;;  %p2454_p6 = scmp.lt.s32.totalorder %s192_s16, %s192_s16 }
  0xb6   :  { %p2450_p5 = scmp.ne.s32.totalorder %s192_s16, %s2449_s29  ;;  %p2455_p7 = scmp.lt.s32.totalorder %s2449_s29, %s2449_s29 }
  0xb8   :  { %p2456_p8 = por %p2455_p7, %p2454_p6 }
  0xba   :  { %p2457_p9 = pnand %p2456_p8, %p2450_p5 }
  0xbc   :  { %2460 = shalt.err (!%p2457_p9)
}
  0xbd   :  { %197 = dma.hbm_to_vmem [thread:$0]  %s2996_s14, 1536, %s192_s16, [#allocation21], %s2564_s28, %s2564_s28, %s2565_s6  }
  0xbe   :  { %s2469_s12 = scalar_lea.vmem %s218_s10, 512  ;;  %p2474_p11 = scmp.lt.s32.totalorder %s218_s10, %s218_s10 }
  0xbf   :  { %p2470_p10 = scmp.ne.s32.totalorder %s218_s10, %s2469_s12  ;;  %p2475_p12 = scmp.lt.s32.totalorder %s2469_s12, %s2469_s12 }
  0xc1   :  { %p2476_p13 = por %p2475_p12, %p2474_p11 }
  0xc3   :  { %p2477_p0 = pnand %p2476_p13, %p2470_p10 }
  0xc5   :  { %2480 = shalt.err (!%p2477_p0)
}
  0xc6   :  { %223 = dma.hbm_to_vmem [thread:$0]  %s2999_s17, 512, %s218_s10, [#allocation24], %s2564_s28, %s2564_s28, %s2565_s6  }
  0xc7   :  { %s2582_s3 = smov [#allocation28]   ;;  %s2583_s30 = smov [#allocation31]  }
  0xc8   :  { %s241_s11 = sshll.u32 %s2582_s3, 4  ;;  %s267_s14 = sshll.u32 %s2583_s30, 4  ;;  %s242_s11 = int_to_ptr.vmem [resolvable:$true] %s241_s11  ;;  %s268_s14 = int_to_ptr.vmem [resolvable:$true] %s267_s14 }
  0xc9   :  { %s2489_s8 = scalar_lea.vmem %s242_s11, 512  ;;  %p2494_p2 = scmp.lt.s32.totalorder %s242_s11, %s242_s11 }
  0xca   :  { %p2490_p1 = scmp.ne.s32.totalorder %s242_s11, %s2489_s8  ;;  %p2495_p3 = scmp.lt.s32.totalorder %s2489_s8, %s2489_s8 }
  0xcc   :  { %p2496_p4 = por %p2495_p3, %p2494_p2 }
  0xce   :  { %p2497_p5 = pnand %p2496_p4, %p2490_p1 }
  0xd0   :  { %2500 = shalt.err (!%p2497_p5)
}
  0xd1   :  { %247 = dma.hbm_to_vmem [thread:$0]  %s3001_s19, 512, %s242_s11, [#allocation27], %s2564_s28, %s2564_s28, %s2565_s6  }
  0xd2   :  { %s2509_s17 = scalar_lea.vmem %s268_s14, 1536  ;;  %p2514_p7 = scmp.lt.s32.totalorder %s268_s14, %s268_s14 }
  0xd3   :  { %p2510_p6 = scmp.ne.s32.totalorder %s268_s14, %s2509_s17  ;;  %p2515_p8 = scmp.lt.s32.totalorder %s2509_s17, %s2509_s17 }
  0xd5   :  { %p2516_p9 = por %p2515_p8, %p2514_p7 }
  0xd7   :  { %p2517_p10 = pnand %p2516_p9, %p2510_p6 }
  0xd9   :  { %2520 = shalt.err (!%p2517_p10)
}
  0xda   :  { %273 = dma.hbm_to_vmem [thread:$0]  %s3004_s22, 1536, %s268_s14, [#allocation30], %s2564_s28, %s2564_s28, %s2565_s6  }
  0xdb   :  { %2541 = dma.done.wait [#allocation3], 128  }
  0xdc   :  { %2542 = vsyncadd [#allocation3], 4294967168 }
  0xdd   :  { %2543 = dma.done.wait [#allocation6], 2048  }
  0xde   :  { %2544 = vsyncadd [#allocation6], 4294965248 }
  0xdf   :  { %2545 = dma.done.wait [#allocation9], 2048  }
  0xe0   :  { %2546 = vsyncadd [#allocation9], 4294965248 }
  0xe1   :  { %2547 = dma.done.wait [#allocation12], 1024  }
  0xe2   :  { %2548 = vsyncadd [#allocation12], 4294966272 }
  0xe3   :  { %2549 = dma.done.wait [#allocation15], 2048  }
  0xe4   :  { %2550 = vsyncadd [#allocation15], 4294965248 }
  0xe5   :  { %2551 = dma.done.wait [#allocation18], 1024  }
  0xe6   :  { %2552 = vsyncadd [#allocation18], 4294966272 }
  0xe7   :  { %2553 = dma.done.wait [#allocation21], 2048  }
  0xe8   :  { %2554 = vsyncadd [#allocation21], 4294965248 }
  0xe9   :  { %2555 = dma.done.wait [#allocation24], 1024  }
  0xea   :  { %2556 = vsyncadd [#allocation24], 4294966272 }
  0xeb   :  { %2557 = dma.done.wait [#allocation27], 2048  }
  0xec   :  { %2558 = vsyncadd [#allocation27], 4294965248 }
  0xed   :  { %2559 = dma.done.wait [#allocation30], 2048  }
  0xee   :  { %2560 = vsyncadd [#allocation30], 4294965248  ;;  %v2584_v0 = vmov 0.0   ;;  %vm2585_vm0 = vmmov 0   ;;  %v349_v1 = vld [vmem:[#allocation5 + $0x58] sm:$0xff]  ;;  %v348_v2 = vld [vmem:[#allocation5 + $0x50] sm:$0xff] }
  0xef   :  { %1828 = vmatprep.subr.mxu0 %v2584_v0  ;;  %1852 = vmatprep.mubr.msk.f32.mxu0 %vm2585_vm0, %v2584_v0  ;;  %v347_v3 = vld [vmem:[#allocation5 + $0x48] sm:$0xff]  ;;  %v346_v4 = vld [vmem:[#allocation5 + $0x40] sm:$0xff]  ;;  %v345_v5 = vld [vmem:[#allocation5 + $0x38] sm:$0xff]  ;;  %vm350_vm1 = vcmask 785408   ;;  %s3025_s28 = sld [smem:[#allocation45_spill]]  ;;  %vm424_vm2 = vcmask 64512  }
  0xf0   :  { %1829 = vmatpush3.msra.mxu0 %v349_v1  ;;  %v344_v6 = vld [vmem:[#allocation5 + $0x30] sm:$0xff]  ;;  %v343_v7 = vld [vmem:[#allocation5 + $0x28] sm:$0xff]  ;;  %v342_v8 = vld [vmem:[#allocation5 + $0x20] sm:$0xff]  ;;  %vm558_vm3 = vcmask 261120   ;;  %s3026_s29 = sld [smem:[#allocation47_spill]]  ;;  %s2586_s22 = smov [#allocation32]  }
  0xf1   :  { %1830 = vmatprep.subr.mxu0 %v2584_v0  ;;  %v341_v9 = vld [vmem:[#allocation5 + $0x18] sm:$0xff]  ;;  %v340_v10 = vld [vmem:[#allocation5 + $0x10] sm:$0xff]  ;;  %v339_v11 = vld [vmem:[#allocation5 + $0x8] sm:$0xff] }
  0xf2   :  { %1831 = vmatpush3.msra.mxu0 %v348_v2  ;;  %v338_v12 = vld [vmem:[#allocation5] sm:$0xff]  ;;  %v2836_v13 = vld [vmem:[#allocation2] sm:$0xff]  ;;  %v531_v31 = vld [vmem:[#allocation7 + $0x8] sm:$0xff] }
  0xf3   :  { %1832 = vmatprep.subr.mxu0 %v2584_v0  ;;  %v542_v20 = vld [vmem:[#allocation8] sm:$0xff]  ;;  %v533_v27 = vld [vmem:[#allocation7 + $0x18] sm:$0xff]  ;;  %v532_v33 = vld [vmem:[#allocation7 + $0x10] sm:$0xff] }
  0xf4   :  { %1833 = vmatpush3.msra.mxu0 %v347_v3  ;;  %1871 = vmatprep.mubr.msk.f32.mxu1 %vm558_vm3, %v542_v20  ;;  %v530_v37 = vld [vmem:[#allocation7] sm:$0xff]  ;;  %v543_v45 = vld [vmem:[#allocation8 + $0x8] sm:$0xff]  ;;  %v557_v46 = vld [vmem:[#allocation10 + $0x58] sm:$0xff] }
  0xf5   :  { %1834 = vmatprep.subr.mxu0 %v2584_v0  ;;  %v334_v14 = vld [vmem:[%s3025_s28] sm:$0xff]  ;;  %v335_v16 = vld [vmem:[%s3025_s28 + $0x8] sm:$0xff]  ;;  %v336_v17 = vld [vmem:[%s3025_s28 + $0x10] sm:$0xff] }
  0xf6   :  { %1835 = vmatpush3.msra.mxu0 %v346_v4  ;;  %v337_v19 = vld [vmem:[%s3025_s28 + $0x18] sm:$0xff]  ;;  %v523_v22 = vld [vmem:[%s3026_s29 + $0x8] sm:$0xff]  ;;  %v522_v25 = vld [vmem:[%s3026_s29] sm:$0xff]  ;;  %s1639_s28 = sshll.u32 %s2586_s22, 4  ;;  %s1640_s28 = int_to_ptr.vmem [resolvable:$true] %s1639_s28 }
  0xf7   :  { %1836 = vmatprep.subr.mxu0 %v2584_v0  ;;  %v525_v24 = vld [vmem:[%s3026_s29 + $0x18] sm:$0xff]  ;;  %v524_v28 = vld [vmem:[%s3026_s29 + $0x10] sm:$0xff]  ;;  %v545_v49 = vld [vmem:[#allocation8 + $0x18] sm:$0xff]  ;;  %s2521_s6 = scalar_lea.vmem %s1640_s28, 128  ;;  %p2526_p12 = scmp.lt.s32.totalorder %s1640_s28, %s1640_s28 }
  0xf8   :  { %1837 = vmatpush3.msra.mxu0 %v345_v5  ;;  %v544_v47 = vld [vmem:[#allocation8 + $0x10] sm:$0xff]  ;;  %v555_v50 = vld [vmem:[#allocation10 + $0x48] sm:$0xff]  ;;  %v554_v51 = vld [vmem:[#allocation10 + $0x40] sm:$0xff]  ;;  %p2522_p11 = scmp.ne.s32.totalorder %s1640_s28, %s2521_s6  ;;  %p2527_p13 = scmp.lt.s32.totalorder %s2521_s6, %s2521_s6 }
  0xf9   :  { %1838 = vmatprep.subr.mxu0 %v2584_v0  ;;  %v556_v48 = vld [vmem:[#allocation10 + $0x50] sm:$0xff]  ;;  %v553_v52 = vld [vmem:[#allocation10 + $0x38] sm:$0xff]  ;;  %v551_v54 = vld [vmem:[#allocation10 + $0x28] sm:$0xff] }
  0xfa   :  { %1839 = vmatpush3.msra.mxu0 %v344_v6  ;;  %v552_v53 = vld [vmem:[#allocation10 + $0x30] sm:$0xff]  ;;  %v550_v55 = vld [vmem:[#allocation10 + $0x20] sm:$0xff]  ;;  %v549_v56 = vld [vmem:[#allocation10 + $0x18] sm:$0xff]  ;;  %p2528_p0 = por %p2527_p13, %p2526_p12 }
  0xfb   :  { %1840 = vmatprep.subr.mxu0 %v2584_v0  ;;  %v548_v57 = vld [vmem:[#allocation10 + $0x10] sm:$0xff]  ;;  %v547_v58 = vld [vmem:[#allocation10 + $0x8] sm:$0xff]  ;;  %v546_v59 = vld [vmem:[#allocation10] sm:$0xff] }
  0xfc   :  { %1841 = vmatpush3.msra.mxu0 %v343_v7  ;;  %v773_v1 = vld [vmem:[#allocation14] sm:$0xff]  ;;  %v754_v3 = vld [vmem:[#allocation11 + $0x8] sm:$0xff]  ;;  %v756_v5 = vld [vmem:[#allocation11 + $0x18] sm:$0xff]  ;;  %p2529_p1 = pnand %p2528_p0, %p2522_p11 }
  0xfd   :  { %1842 = vmatprep.subr.mxu0 %v2584_v0  ;;  %v753_v6 = vld [vmem:[#allocation11] sm:$0xff] }
  0xfe   :  { %1843 = vmatpush3.msra.mxu0 %v342_v8  ;;  %v764_v8 = vld [vmem:[#allocation13 + $0x18] sm:$0xff] }
  0xff   :  { %1844 = vmatprep.subr.mxu0 %v2584_v0 }
 0x100   :  { %1845 = vmatpush3.msra.mxu0 %v341_v9  ;;  %v755_v9 = vld [vmem:[#allocation11 + $0x10] sm:$0xff] }
 0x101   :  { %1846 = vmatprep.subr.mxu0 %v2584_v0 }
 0x102   :  { %1847 = vmatpush3.msra.mxu0 %v340_v10 }
 0x103   :  { %1848 = vmatprep.subr.mxu0 %v2584_v0 }
 0x104   :  { %1849 = vmatpush3.msra.mxu0 %v339_v11 }
 0x105   :  { %1850 = vmatprep.subr.mxu0 %v2584_v0 }
 0x106   :  { %1851 = vmatpush3.msra.mxu0 %v338_v12  ;;  %v762_v12 = vld [vmem:[#allocation13 + $0x8] sm:$0xff] }
 0x107   :  { %1853 = vmatmul.mubr.msk.f32.vlgmr.msra.gmra.mxu0 %vm350_vm1, %v2836_v13 }
 0x108   :  { %1857 = vmatprep.mubr.msk.f32.mxu0 %vm424_vm2, %v334_v14 }
 0x1c7   :  { %v420_v15 = vpop.f32.mrf.mxu0 }
 0x1c8   :  { %1855 = vmatprep.subr.mxu0 %v420_v15 }
 0x1c9   :  { %v1854_v18 = vpop.f32.mrf.mxu0  ;;  %1856 = vmatpush3.msra.mxu0 %v420_v15  ;;  %v763_v15 = vld [vmem:[#allocation13 + $0x10] sm:$0xff] }
 0x1ca   :  { %1858 = vmatmul.mubr.msk.f32.vlgmr.msra.gmra.mxu0 %vm424_vm2, %v335_v16 }
 0x1cb   :  { %1860 = vmatprep.mubr.msk.f32.mxu0 %vm424_vm2, %v336_v17 }
 0x1ce   :  { %1861 = vmatmul.mubr.msk.f32.gmra.mxu0 %vm424_vm2, %v337_v19  ;;  %v761_v19 = vld [vmem:[#allocation13] sm:$0xff] }
 0x1cf   :  { %1915 = vmatprep.mubr.msk.f32.mxu0 %vm558_vm3, %v773_v1  ;;  %v991_v1 = vld [vmem:[#allocation19] sm:$0xff] }
 0x28a   :  { %v1859_v21 = vpop.f32.mrf.mxu0 }
 0x28b   :  { %v527_v29 = vmul.f32 %v1859_v21, %v523_v22 }
 0x28c   :  { %v503_v23 = vpop.f32.mrf.mxu0 }
 0x28d   :  { %v526_v34 = vmul.f32 %v522_v25, %v503_v23  ;;  %v535_v38 = vadd.f32 %v531_v31, %v527_v29  ;;  %v775_v29 = vld [vmem:[#allocation14 + $0x10] sm:$0xff]  ;;  %v776_v31 = vld [vmem:[#allocation14 + $0x18] sm:$0xff] }
 0x28e   :  { %v1862_v26 = vpop.f32.mrf.mxu0 }
 0x28f   :  { %v529_v30 = vmul.f32 %v1862_v26, %v525_v24  ;;  %v534_v40 = vadd.f32 %v530_v37, %v526_v34  ;;  %v784_v34 = vld [vmem:[#allocation16 + $0x38] sm:$0xff]  ;;  %v781_v37 = vld [vmem:[#allocation16 + $0x20] sm:$0xff] }
 0x290   :  { %v513_v32 = vpop.f32.mrf.mxu0 }
 0x291   :  { %v537_v35 = vadd.f32 %v533_v27, %v529_v30  ;;  %v528_v36 = vmul.f32 %v524_v28, %v513_v32  ;;  %v774_v27 = vld [vmem:[#allocation14 + $0x8] sm:$0xff]  ;;  %v788_v28 = vld [vmem:[#allocation16 + $0x58] sm:$0xff]  ;;  %v787_v30 = vld [vmem:[#allocation16 + $0x50] sm:$0xff] }
 0x292   :  { %v786_v32 = vld [vmem:[#allocation16 + $0x48] sm:$0xff] }
 0x293   :  { %2101 = vtanh.f32 %v537_v35  ;;  %v536_v39 = vadd.f32 %v532_v33, %v528_v36  ;;  %v785_v33 = vld [vmem:[#allocation16 + $0x40] sm:$0xff]  ;;  %v783_v35 = vld [vmem:[#allocation16 + $0x30] sm:$0xff]  ;;  %v782_v36 = vld [vmem:[#allocation16 + $0x28] sm:$0xff] }
 0x295   :  { %2103 = vtanh.f32 %v536_v39  ;;  %v779_v39 = vld [vmem:[#allocation16 + $0x10] sm:$0xff] }
 0x296   :  { %2105 = vtanh.f32 %v535_v38  ;;  %v780_v38 = vld [vmem:[#allocation16 + $0x18] sm:$0xff] }
 0x297   :  { %2107 = vtanh.f32 %v534_v40  ;;  %v778_v40 = vld [vmem:[#allocation16 + $0x8] sm:$0xff] }
 0x2a0   :  { %v2866_v41 = vpop.eup %2101 }
 0x2a1   :  { %1863 = vmatprep.subr.mxu1 %v2866_v41 }
 0x2a2   :  { %v2869_v42 = vpop.eup %2103  ;;  %1864 = vmatpush3.msra.mxu1 %v2866_v41 }
 0x2a3   :  { %1865 = vmatprep.subr.mxu1 %v2869_v42  ;;  %v2873_v43 = vpop.eup %2105 }
 0x2a4   :  { %1866 = vmatpush3.msra.mxu1 %v2869_v42  ;;  %v2877_v44 = vpop.eup %2107 }
 0x2a5   :  { %1867 = vmatprep.subr.mxu1 %v2873_v43 }
 0x2a6   :  { %1868 = vmatpush3.msra.mxu1 %v2873_v43 }
 0x2a7   :  { %1869 = vmatprep.subr.mxu1 %v2877_v44 }
 0x2a8   :  { %1870 = vmatpush3.msra.mxu1 %v2877_v44 }
 0x2a9   :  { %1872 = vmatmul.mubr.msk.f32.vlgmr.msra.gmra.mxu1 %vm558_vm3, %v543_v45  ;;  %1877 = vmatprep.subr.mxu1 %v557_v46  ;;  %v777_v45 = vld [vmem:[#allocation16] sm:$0xff] }
 0x2aa   :  { %1874 = vmatprep.mubr.msk.f32.mxu1 %vm558_vm3, %v544_v47  ;;  %1878 = vmatpush3.msra.mxu1 %v557_v46 }
 0x2ab   :  { %1879 = vmatprep.subr.mxu1 %v556_v48 }
 0x2ac   :  { %1880 = vmatpush3.msra.mxu1 %v556_v48 }
 0x2ad   :  { %1875 = vmatmul.mubr.msk.f32.gmra.mxu1 %vm558_vm3, %v545_v49  ;;  %1881 = vmatprep.subr.mxu1 %v555_v50 }
 0x2ae   :  { %1882 = vmatpush3.msra.mxu1 %v555_v50  ;;  %v1007_v50 = vld [vmem:[#allocation20] sm:$0xff] }
 0x2af   :  { %1883 = vmatprep.subr.mxu1 %v554_v51 }
 0x2b0   :  { %1884 = vmatpush3.msra.mxu1 %v554_v51  ;;  %v984_v51 = vld [vmem:[#allocation17 + $0x8] sm:$0xff] }
 0x2b1   :  { %1885 = vmatprep.subr.mxu1 %v553_v52 }
 0x2b2   :  { %1886 = vmatpush3.msra.mxu1 %v553_v52 }
 0x2b3   :  { %1887 = vmatprep.subr.mxu1 %v552_v53 }
 0x2b4   :  { %1888 = vmatpush3.msra.mxu1 %v552_v53 }
 0x2b5   :  { %1889 = vmatprep.subr.mxu1 %v551_v54 }
 0x2b6   :  { %1890 = vmatpush3.msra.mxu1 %v551_v54 }
 0x2b7   :  { %1891 = vmatprep.subr.mxu1 %v550_v55 }
 0x2b8   :  { %1892 = vmatpush3.msra.mxu1 %v550_v55  ;;  %v983_v55 = vld [vmem:[#allocation17] sm:$0xff] }
 0x2b9   :  { %1893 = vmatprep.subr.mxu1 %v549_v56 }
 0x2ba   :  { %1894 = vmatpush3.msra.mxu1 %v549_v56  ;;  %v986_v56 = vld [vmem:[#allocation17 + $0x18] sm:$0xff] }
 0x2bb   :  { %1895 = vmatprep.subr.mxu1 %v548_v57 }
 0x2bc   :  { %1896 = vmatpush3.msra.mxu1 %v548_v57  ;;  %v992_v57 = vld [vmem:[#allocation19 + $0x8] sm:$0xff] }
 0x2bd   :  { %1897 = vmatprep.subr.mxu1 %v547_v58 }
 0x2be   :  { %1898 = vmatpush3.msra.mxu1 %v547_v58 }
 0x2bf   :  { %1899 = vmatprep.subr.mxu1 %v546_v59 }
 0x2c0   :  { %1900 = vmatpush3.msra.mxu1 %v546_v59  ;;  %v994_v59 = vld [vmem:[#allocation19 + $0x18] sm:$0xff] }
 0x369   :  { %v1873_v60 = vpop.f32.mrf.mxu1 }
 0x36b   :  { %v637_v61 = vpop.f32.mrf.mxu1 }
 0x36c   :  { %1901 = vmatprep.mubr.msk.f32.mxu1 %vm350_vm1, %v637_v61 }
 0x36d   :  { %v1876_v62 = vpop.f32.mrf.mxu1  ;;  %1902 = vmatmul.mubr.msk.f32.vlgmr.msra.gmra.mxu1 %vm350_vm1, %v1873_v60  ;;  %v985_v60 = vld [vmem:[#allocation17 + $0x10] sm:$0xff] }
 0x36f   :  { %v647_v63 = vpop.f32.mrf.mxu1 }
 0x370   :  { %1904 = vmatprep.mubr.msk.f32.mxu1 %vm350_vm1, %v647_v63 }
 0x371   :  { %1905 = vmatmul.mubr.msk.f32.gmra.mxu1 %vm350_vm1, %v1876_v62 }
 0x372   :  { %1959 = vmatprep.mubr.msk.f32.mxu1 %vm558_vm3, %v1007_v50 }
 0x42d   :  { %v1903_v2 = vpop.f32.mrf.mxu1 }
 0x42e   :  { %v758_v10 = vmul.f32 %v1903_v2, %v754_v3  ;;  %v993_v3 = vld [vmem:[#allocation19 + $0x10] sm:$0xff] }
 0x42f   :  { %v734_v4 = vpop.f32.mrf.mxu1 }
 0x430   :  { %v757_v16 = vmul.f32 %v753_v6, %v734_v4  ;;  %v766_v20 = vadd.f32 %v762_v12, %v758_v10 }
 0x431   :  { %v1906_v7 = vpop.f32.mrf.mxu1 }
 0x432   :  { %v760_v11 = vmul.f32 %v1906_v7, %v756_v5  ;;  %v765_v22 = vadd.f32 %v761_v19, %v757_v16  ;;  %v1008_v16 = vld [vmem:[#allocation20 + $0x8] sm:$0xff] }
 0x433   :  { %v744_v14 = vpop.f32.mrf.mxu1  ;;  %v1020_v19 = vld [vmem:[#allocation22 + $0x48] sm:$0xff] }
 0x434   :  { %v768_v17 = vadd.f32 %v764_v8, %v760_v11  ;;  %v759_v18 = vmul.f32 %v755_v9, %v744_v14 }
 0x436   :  { %2109 = vtanh.f32 %v768_v17  ;;  %v767_v21 = vadd.f32 %v763_v15, %v759_v18  ;;  %v1009_v17 = vld [vmem:[#allocation20 + $0x10] sm:$0xff] }
 0x437   :  { %v1021_v18 = vld [vmem:[#allocation22 + $0x50] sm:$0xff] }
 0x438   :  { %2111 = vtanh.f32 %v767_v21  ;;  %v1017_v21 = vld [vmem:[#allocation22 + $0x30] sm:$0xff] }
 0x439   :  { %2113 = vtanh.f32 %v766_v20  ;;  %v1018_v20 = vld [vmem:[#allocation22 + $0x38] sm:$0xff] }
 0x43a   :  { %2115 = vtanh.f32 %v765_v22  ;;  %v1016_v22 = vld [vmem:[#allocation22 + $0x28] sm:$0xff] }
 0x443   :  { %v2110_v23 = vpop.eup %2109 }
 0x444   :  { %1907 = vmatprep.subr.mxu0 %v2110_v23 }
 0x445   :  { %v2112_v24 = vpop.eup %2111  ;;  %1908 = vmatpush3.msra.mxu0 %v2110_v23  ;;  %v1015_v23 = vld [vmem:[#allocation22 + $0x20] sm:$0xff] }
 0x446   :  { %1909 = vmatprep.subr.mxu0 %v2112_v24  ;;  %v2114_v25 = vpop.eup %2113 }
 0x447   :  { %1910 = vmatpush3.msra.mxu0 %v2112_v24  ;;  %v2116_v26 = vpop.eup %2115  ;;  %v1014_v24 = vld [vmem:[#allocation22 + $0x18] sm:$0xff] }
 0x448   :  { %1911 = vmatprep.subr.mxu0 %v2114_v25 }
 0x449   :  { %1912 = vmatpush3.msra.mxu0 %v2114_v25  ;;  %v1013_v25 = vld [vmem:[#allocation22 + $0x10] sm:$0xff] }
 0x44a   :  { %1913 = vmatprep.subr.mxu0 %v2116_v26 }
 0x44b   :  { %1914 = vmatpush3.msra.mxu0 %v2116_v26  ;;  %v1012_v26 = vld [vmem:[#allocation22 + $0x8] sm:$0xff] }
 0x44c   :  { %1916 = vmatmul.mubr.msk.f32.vlgmr.msra.gmra.mxu0 %vm558_vm3, %v774_v27  ;;  %1921 = vmatprep.subr.mxu0 %v788_v28  ;;  %v1011_v27 = vld [vmem:[#allocation22] sm:$0xff] }
 0x44d   :  { %1918 = vmatprep.mubr.msk.f32.mxu0 %vm558_vm3, %v775_v29  ;;  %1922 = vmatpush3.msra.mxu0 %v788_v28 }
 0x44e   :  { %1923 = vmatprep.subr.mxu0 %v787_v30 }
 0x44f   :  { %1924 = vmatpush3.msra.mxu0 %v787_v30 }
 0x450   :  { %1919 = vmatmul.mubr.msk.f32.gmra.mxu0 %vm558_vm3, %v776_v31  ;;  %1925 = vmatprep.subr.mxu0 %v786_v32 }
 0x451   :  { %1926 = vmatpush3.msra.mxu0 %v786_v32  ;;  %v1237_v32 = vld [vmem:[#allocation25] sm:$0xff] }
 0x452   :  { %1927 = vmatprep.subr.mxu0 %v785_v33 }
 0x453   :  { %1928 = vmatpush3.msra.mxu0 %v785_v33 }
 0x454   :  { %1929 = vmatprep.subr.mxu0 %v784_v34 }
 0x455   :  { %1930 = vmatpush3.msra.mxu0 %v784_v34  ;;  %v1218_v34 = vld [vmem:[%s2997_s15 + $0x8] sm:$0xff] }
 0x456   :  { %1931 = vmatprep.subr.mxu0 %v783_v35 }
 0x457   :  { %1932 = vmatpush3.msra.mxu0 %v783_v35 }
 0x458   :  { %1933 = vmatprep.subr.mxu0 %v782_v36 }
 0x459   :  { %1934 = vmatpush3.msra.mxu0 %v782_v36  ;;  %v1220_v36 = vld [vmem:[%s2997_s15 + $0x18] sm:$0xff] }
 0x45a   :  { %1935 = vmatprep.subr.mxu0 %v781_v37 }
 0x45b   :  { %1936 = vmatpush3.msra.mxu0 %v781_v37  ;;  %v1217_v37 = vld [vmem:[%s2997_s15] sm:$0xff] }
 0x45c   :  { %1937 = vmatprep.subr.mxu0 %v780_v38 }
 0x45d   :  { %1938 = vmatpush3.msra.mxu0 %v780_v38 }
 0x45e   :  { %1939 = vmatprep.subr.mxu0 %v779_v39 }
 0x45f   :  { %1940 = vmatpush3.msra.mxu0 %v779_v39  ;;  %v1228_v39 = vld [vmem:[#allocation23 + $0x18] sm:$0xff] }
 0x460   :  { %1941 = vmatprep.subr.mxu0 %v778_v40 }
 0x461   :  { %1942 = vmatpush3.msra.mxu0 %v778_v40  ;;  %v1219_v40 = vld [vmem:[%s2997_s15 + $0x10] sm:$0xff] }
 0x462   :  { %1943 = vmatprep.subr.mxu0 %v777_v45 }
 0x463   :  { %1944 = vmatpush3.msra.mxu0 %v777_v45 }
 0x50c   :  { %v1917_v46 = vpop.f32.mrf.mxu0 }
 0x50e   :  { %v867_v47 = vpop.f32.mrf.mxu0 }
 0x50f   :  { %1945 = vmatprep.mubr.msk.f32.mxu0 %vm350_vm1, %v867_v47  ;;  %v1226_v47 = vld [vmem:[#allocation23 + $0x8] sm:$0xff] }
 0x510   :  { %v1920_v48 = vpop.f32.mrf.mxu0  ;;  %1946 = vmatmul.mubr.msk.f32.vlgmr.msra.gmra.mxu0 %vm350_vm1, %v1917_v46 }
 0x512   :  { %v877_v49 = vpop.f32.mrf.mxu0 }
 0x513   :  { %1948 = vmatprep.mubr.msk.f32.mxu0 %vm350_vm1, %v877_v49  ;;  %v1227_v49 = vld [vmem:[#allocation23 + $0x10] sm:$0xff] }
 0x514   :  { %1949 = vmatmul.mubr.msk.f32.gmra.mxu0 %vm350_vm1, %v1920_v48 }
 0x515   :  { %2003 = vmatprep.mubr.msk.f32.mxu0 %vm558_vm3, %v1237_v32 }
 0x5d0   :  { %v1947_v52 = vpop.f32.mrf.mxu0 }
 0x5d1   :  { %v988_v53 = vmul.f32 %v1947_v52, %v984_v51 }
 0x5d2   :  { %v964_v54 = vpop.f32.mrf.mxu0 }
 0x5d3   :  { %v987_v61 = vmul.f32 %v983_v55, %v964_v54  ;;  %v996_v63 = vadd.f32 %v992_v57, %v988_v53  ;;  %v1225_v53 = vld [vmem:[#allocation23] sm:$0xff] }
 0x5d4   :  { %v1950_v58 = vpop.f32.mrf.mxu0 }
 0x5d5   :  { %v990_v62 = vmul.f32 %v1950_v58, %v986_v56  ;;  %v995_v6 = vadd.f32 %v991_v1, %v987_v61  ;;  %v1238_v61 = vld [vmem:[#allocation25 + $0x8] sm:$0xff]  ;;  %v1251_v1 = vld [vmem:[#allocation26 + $0x50] sm:$0xff] }
 0x5d6   :  { %v974_v2 = vpop.f32.mrf.mxu0 }
 0x5d7   :  { %v998_v4 = vadd.f32 %v994_v59, %v990_v62  ;;  %v989_v5 = vmul.f32 %v985_v60, %v974_v2  ;;  %v1252_v62 = vld [vmem:[#allocation26 + $0x58] sm:$0xff] }
 0x5d8   :  { %v1240_v2 = vld [vmem:[#allocation25 + $0x18] sm:$0xff] }
 0x5d9   :  { %2117 = vtanh.f32 %v998_v4  ;;  %v997_v7 = vadd.f32 %v993_v3, %v989_v5  ;;  %v1250_v3 = vld [vmem:[#allocation26 + $0x48] sm:$0xff]  ;;  %v1249_v4 = vld [vmem:[#allocation26 + $0x40] sm:$0xff]  ;;  %v1248_v5 = vld [vmem:[#allocation26 + $0x38] sm:$0xff] }
 0x5da   :  { %2119 = vtanh.f32 %v996_v63  ;;  %v1239_v63 = vld [vmem:[#allocation25 + $0x10] sm:$0xff] }
 0x5db   :  { %2121 = vtanh.f32 %v997_v7  ;;  %v1246_v7 = vld [vmem:[#allocation26 + $0x28] sm:$0xff] }
 0x5dc   :  { %2123 = vtanh.f32 %v995_v6  ;;  %v1247_v6 = vld [vmem:[#allocation26 + $0x30] sm:$0xff] }
 0x5e6   :  { %v2118_v8 = vpop.eup %2117 }
 0x5e7   :  { %v2120_v9 = vpop.eup %2119  ;;  %v2899_v10 = vadd.f32 %v2118_v8, %v2866_v41  ;;  %v1245_v8 = vld [vmem:[#allocation26 + $0x20] sm:$0xff] }
 0x5e8   :  { %v2122_v11 = vpop.eup %2121  ;;  %v2908_v15 = vadd.f32 %v2120_v9, %v2873_v43  ;;  %v1010_v43 = vld [vmem:[#allocation20 + $0x18] sm:$0xff] }
 0x5e9   :  { %1951 = vmatprep.subr.mxu1 %v2899_v10  ;;  %v2903_v12 = vadd.f32 %v2122_v11, %v2869_v42  ;;  %v2124_v14 = vpop.eup %2123  ;;  %v1022_v42 = vld [vmem:[#allocation22 + $0x58] sm:$0xff]  ;;  %v1243_v11 = vld [vmem:[#allocation26 + $0x10] sm:$0xff] }
 0x5ea   :  { %1952 = vmatpush3.msra.mxu1 %v2899_v10  ;;  %v2913_v41 = vadd.f32 %v2124_v14, %v2877_v44  ;;  %v1019_v44 = vld [vmem:[#allocation22 + $0x40] sm:$0xff]  ;;  %v1244_v9 = vld [vmem:[#allocation26 + $0x18] sm:$0xff]  ;;  %v1242_v14 = vld [vmem:[#allocation26 + $0x8] sm:$0xff] }
 0x5eb   :  { %1953 = vmatprep.subr.mxu1 %v2903_v12 }
 0x5ec   :  { %1954 = vmatpush3.msra.mxu1 %v2903_v12 }
 0x5ed   :  { %1955 = vmatprep.subr.mxu1 %v2908_v15 }
 0x5ee   :  { %1956 = vmatpush3.msra.mxu1 %v2908_v15 }
 0x5ef   :  { %1957 = vmatprep.subr.mxu1 %v2913_v41 }
 0x5f0   :  { %1958 = vmatpush3.msra.mxu1 %v2913_v41 }
 0x5f1   :  { %1960 = vmatmul.mubr.msk.f32.vlgmr.msra.gmra.mxu1 %vm558_vm3, %v1008_v16  ;;  %1965 = vmatprep.subr.mxu1 %v1022_v42  ;;  %v1241_v16 = vld [vmem:[#allocation26] sm:$0xff] }
 0x5f2   :  { %1962 = vmatprep.mubr.msk.f32.mxu1 %vm558_vm3, %v1009_v17  ;;  %1966 = vmatpush3.msra.mxu1 %v1022_v42 }
 0x5f3   :  { %1967 = vmatprep.subr.mxu1 %v1021_v18 }
 0x5f4   :  { %1968 = vmatpush3.msra.mxu1 %v1021_v18 }
 0x5f5   :  { %1963 = vmatmul.mubr.msk.f32.gmra.mxu1 %vm558_vm3, %v1010_v43  ;;  %1969 = vmatprep.subr.mxu1 %v1020_v19 }
 0x5f6   :  { %1970 = vmatpush3.msra.mxu1 %v1020_v19  ;;  %v1448_v19 = vld [vmem:[#allocation28 + $0x8] sm:$0xff] }
 0x5f7   :  { %1971 = vmatprep.subr.mxu1 %v1019_v44 }
 0x5f8   :  { %1972 = vmatpush3.msra.mxu1 %v1019_v44 }
 0x5f9   :  { %1973 = vmatprep.subr.mxu1 %v1018_v20 }
 0x5fa   :  { %1974 = vmatpush3.msra.mxu1 %v1018_v20 }
 0x5fb   :  { %1975 = vmatprep.subr.mxu1 %v1017_v21 }
 0x5fc   :  { %1976 = vmatpush3.msra.mxu1 %v1017_v21 }
 0x5fd   :  { %1977 = vmatprep.subr.mxu1 %v1016_v22 }
 0x5fe   :  { %1978 = vmatpush3.msra.mxu1 %v1016_v22  ;;  %v1447_v22 = vld [vmem:[#allocation28] sm:$0xff] }
 0x5ff   :  { %1979 = vmatprep.subr.mxu1 %v1015_v23 }
 0x600   :  { %1980 = vmatpush3.msra.mxu1 %v1015_v23  ;;  %v1450_v23 = vld [vmem:[#allocation28 + $0x18] sm:$0xff] }
 0x601   :  { %1981 = vmatprep.subr.mxu1 %v1014_v24 }
 0x602   :  { %1982 = vmatpush3.msra.mxu1 %v1014_v24  ;;  %v1456_v24 = vld [vmem:[#allocation29 + $0x8] sm:$0xff] }
 0x603   :  { %1983 = vmatprep.subr.mxu1 %v1013_v25 }
 0x604   :  { %1984 = vmatpush3.msra.mxu1 %v1013_v25 }
 0x605   :  { %1985 = vmatprep.subr.mxu1 %v1012_v26 }
 0x606   :  { %1986 = vmatpush3.msra.mxu1 %v1012_v26  ;;  %v1458_v26 = vld [vmem:[#allocation29 + $0x18] sm:$0xff] }
 0x607   :  { %1987 = vmatprep.subr.mxu1 %v1011_v27 }
 0x608   :  { %1988 = vmatpush3.msra.mxu1 %v1011_v27  ;;  %v1449_v27 = vld [vmem:[#allocation28 + $0x10] sm:$0xff] }
 0x609   :  { %2039 = vmatprep.subr.mxu1 %v2584_v0 }
 0x6b1   :  { %v1961_v28 = vpop.f32.mrf.mxu1 }
 0x6b3   :  { %v1101_v29 = vpop.f32.mrf.mxu1 }
 0x6b4   :  { %1989 = vmatprep.mubr.msk.f32.mxu1 %vm350_vm1, %v1101_v29 }
 0x6b5   :  { %v1964_v30 = vpop.f32.mrf.mxu1  ;;  %1990 = vmatmul.mubr.msk.f32.vlgmr.msra.gmra.mxu1 %vm350_vm1, %v1961_v28 }
 0x6b7   :  { %v1111_v31 = vpop.f32.mrf.mxu1 }
 0x6b8   :  { %1992 = vmatprep.mubr.msk.f32.mxu1 %vm350_vm1, %v1111_v31  ;;  %v1455_v31 = vld [vmem:[#allocation29] sm:$0xff] }
 0x6b9   :  { %1993 = vmatmul.mubr.msk.f32.gmra.mxu1 %vm350_vm1, %v1964_v30 }
 0x6ba   :  { %2047 = vmatprep.mubr.msk.f32.mxu1 %vm2585_vm0, %v2584_v0 }
 0x775   :  { %v1991_v33 = vpop.f32.mrf.mxu1 }
 0x776   :  { %v1222_v45 = vmul.f32 %v1991_v33, %v1218_v34  ;;  %v1457_v33 = vld [vmem:[#allocation29 + $0x10] sm:$0xff] }
 0x777   :  { %v1198_v35 = vpop.f32.mrf.mxu1 }
 0x778   :  { %v1221_v50 = vmul.f32 %v1217_v37, %v1198_v35  ;;  %v1230_v54 = vadd.f32 %v1226_v47, %v1222_v45 }
 0x779   :  { %v1994_v38 = vpop.f32.mrf.mxu1 }
 0x77a   :  { %v1224_v46 = vmul.f32 %v1994_v38, %v1220_v36  ;;  %v1229_v56 = vadd.f32 %v1225_v53, %v1221_v50  ;;  %v1471_v50 = vld [vmem:[%s3003_s21] sm:$0xff]  ;;  %v1477_v53 = vld [vmem:[#allocation31 + $0x28] sm:$0xff] }
 0x77b   :  { %v1208_v48 = vpop.f32.mrf.mxu1 }
 0x77c   :  { %v1232_v51 = vadd.f32 %v1228_v39, %v1224_v46  ;;  %v1223_v52 = vmul.f32 %v1219_v40, %v1208_v48 }
 0x77e   :  { %2125 = vtanh.f32 %v1232_v51  ;;  %v1231_v55 = vadd.f32 %v1227_v49, %v1223_v52  ;;  %v1479_v51 = vld [vmem:[#allocation31 + $0x38] sm:$0xff]  ;;  %v1478_v52 = vld [vmem:[#allocation31 + $0x30] sm:$0xff] }
 0x780   :  { %2127 = vtanh.f32 %v1231_v55  ;;  %v1475_v55 = vld [vmem:[#allocation31 + $0x18] sm:$0xff] }
 0x781   :  { %2129 = vtanh.f32 %v1230_v54  ;;  %v1476_v54 = vld [vmem:[#allocation31 + $0x20] sm:$0xff] }
 0x782   :  { %2131 = vtanh.f32 %v1229_v56  ;;  %v1474_v56 = vld [vmem:[#allocation31 + $0x10] sm:$0xff] }
 0x78b   :  { %v2126_v57 = vpop.eup %2125 }
 0x78c   :  { %1995 = vmatprep.subr.mxu0 %v2126_v57 }
 0x78d   :  { %v2128_v58 = vpop.eup %2127  ;;  %1996 = vmatpush3.msra.mxu0 %v2126_v57  ;;  %v1473_v57 = vld [vmem:[#allocation31 + $0x8] sm:$0xff] }
 0x78e   :  { %1997 = vmatprep.subr.mxu0 %v2128_v58  ;;  %v2130_v59 = vpop.eup %2129 }
 0x78f   :  { %1998 = vmatpush3.msra.mxu0 %v2128_v58  ;;  %v2132_v60 = vpop.eup %2131  ;;  %v1472_v58 = vld [vmem:[#allocation31] sm:$0xff] }
 0x790   :  { %1999 = vmatprep.subr.mxu0 %v2130_v59 }
 0x791   :  { %2000 = vmatpush3.msra.mxu0 %v2130_v59 }
 0x792   :  { %2001 = vmatprep.subr.mxu0 %v2132_v60 }
 0x793   :  { %2002 = vmatpush3.msra.mxu0 %v2132_v60 }
 0x794   :  { %2004 = vmatmul.mubr.msk.f32.vlgmr.msra.gmra.mxu0 %vm558_vm3, %v1238_v61  ;;  %2009 = vmatprep.subr.mxu0 %v1252_v62  ;;  %v1557_v61 = vld [vmem:[%s3005_s23] sm:$0xff] }
 0x795   :  { %2006 = vmatprep.mubr.msk.f32.mxu0 %vm558_vm3, %v1239_v63  ;;  %2010 = vmatpush3.msra.mxu0 %v1252_v62 }
 0x796   :  { %2011 = vmatprep.subr.mxu0 %v1251_v1 }
 0x797   :  { %2012 = vmatpush3.msra.mxu0 %v1251_v1 }
 0x798   :  { %2007 = vmatmul.mubr.msk.f32.gmra.mxu0 %vm558_vm3, %v1240_v2  ;;  %2013 = vmatprep.subr.mxu0 %v1250_v3 }
 0x799   :  { %2014 = vmatpush3.msra.mxu0 %v1250_v3 }
 0x79a   :  { %2015 = vmatprep.subr.mxu0 %v1249_v4 }
 0x79b   :  { %2016 = vmatpush3.msra.mxu0 %v1249_v4 }
 0x79c   :  { %2017 = vmatprep.subr.mxu0 %v1248_v5 }
 0x79d   :  { %2018 = vmatpush3.msra.mxu0 %v1248_v5 }
 0x79e   :  { %2019 = vmatprep.subr.mxu0 %v1247_v6 }
 0x79f   :  { %2020 = vmatpush3.msra.mxu0 %v1247_v6 }
 0x7a0   :  { %2021 = vmatprep.subr.mxu0 %v1246_v7 }
 0x7a1   :  { %2022 = vmatpush3.msra.mxu0 %v1246_v7 }
 0x7a2   :  { %2023 = vmatprep.subr.mxu0 %v1245_v8 }
 0x7a3   :  { %2024 = vmatpush3.msra.mxu0 %v1245_v8 }
 0x7a4   :  { %2025 = vmatprep.subr.mxu0 %v1244_v9 }
 0x7a5   :  { %2026 = vmatpush3.msra.mxu0 %v1244_v9 }
 0x7a6   :  { %2027 = vmatprep.subr.mxu0 %v1243_v11 }
 0x7a7   :  { %2028 = vmatpush3.msra.mxu0 %v1243_v11 }
 0x7a8   :  { %2029 = vmatprep.subr.mxu0 %v1242_v14 }
 0x7a9   :  { %2030 = vmatpush3.msra.mxu0 %v1242_v14 }
 0x7aa   :  { %2031 = vmatprep.subr.mxu0 %v1241_v16 }
 0x7ab   :  { %2032 = vmatpush3.msra.mxu0 %v1241_v16 }
 0x854   :  { %v2005_v42 = vpop.f32.mrf.mxu0 }
 0x856   :  { %v1331_v17 = vpop.f32.mrf.mxu0 }
 0x857   :  { %2033 = vmatprep.mubr.msk.f32.mxu0 %vm350_vm1, %v1331_v17 }
 0x858   :  { %v2008_v18 = vpop.f32.mrf.mxu0  ;;  %2034 = vmatmul.mubr.msk.f32.vlgmr.msra.gmra.mxu0 %vm350_vm1, %v2005_v42 }
 0x85a   :  { %v1341_v43 = vpop.f32.mrf.mxu0 }
 0x85b   :  { %2036 = vmatprep.mubr.msk.f32.mxu0 %vm350_vm1, %v1341_v43 }
 0x85c   :  { %2037 = vmatmul.mubr.msk.f32.gmra.mxu0 %vm350_vm1, %v2008_v18 }
 0x918   :  { %v2035_v44 = vpop.f32.mrf.mxu0 }
 0x919   :  { %v1452_v20 = vmul.f32 %v2035_v44, %v1448_v19 }
 0x91a   :  { %v1428_v21 = vpop.f32.mrf.mxu0 }
 0x91b   :  { %v1451_v28 = vmul.f32 %v1447_v22, %v1428_v21  ;;  %v1460_v30 = vadd.f32 %v1456_v24, %v1452_v20 }
 0x91c   :  { %v2038_v25 = vpop.f32.mrf.mxu0 }
 0x91d   :  { %v1454_v29 = vmul.f32 %v2038_v25, %v1450_v23  ;;  %v1459_v36 = vadd.f32 %v1455_v31, %v1451_v28 }
 0x91e   :  { %v1438_v32 = vpop.f32.mrf.mxu0 }
 0x91f   :  { %v1462_v34 = vadd.f32 %v1458_v26, %v1454_v29  ;;  %v1453_v35 = vmul.f32 %v1449_v27, %v1438_v32 }
 0x921   :  { %2133 = vtanh.f32 %v1462_v34  ;;  %v1461_v37 = vadd.f32 %v1457_v33, %v1453_v35 }
 0x922   :  { %2135 = vtanh.f32 %v1460_v30 }
 0x923   :  { %2137 = vtanh.f32 %v1461_v37 }
 0x924   :  { %2139 = vtanh.f32 %v1459_v36 }
 0x92e   :  { %v2134_v38 = vpop.eup %2133 }
 0x92f   :  { %v2136_v39 = vpop.eup %2135  ;;  %v1470_v40 = vadd.f32 %v2134_v38, %v2899_v10  ;;  %v1483_v10 = vld [vmem:[#allocation31 + $0x58] sm:$0xff] }
 0x930   :  { %v2138_v45 = vpop.eup %2137  ;;  %v1468_v48 = vadd.f32 %v2136_v39, %v2908_v15  ;;  %v1481_v15 = vld [vmem:[#allocation31 + $0x48] sm:$0xff] }
 0x931   :  { %2040 = vmatpush3.msra.mxu1 %v1470_v40  ;;  %v1469_v46 = vadd.f32 %v2138_v45, %v2903_v12  ;;  %v2140_v47 = vpop.eup %2139  ;;  %v1482_v12 = vld [vmem:[#allocation31 + $0x50] sm:$0xff] }
 0x932   :  { %2041 = vmatprep.subr.mxu1 %v2584_v0  ;;  %v1467_v49 = vadd.f32 %v2140_v47, %v2913_v41  ;;  %v1480_v41 = vld [vmem:[#allocation31 + $0x40] sm:$0xff] }
 0x933   :  { %2042 = vmatpush3.msra.mxu1 %v1469_v46 }
 0x934   :  { %2043 = vmatprep.subr.mxu1 %v2584_v0 }
 0x935   :  { %2044 = vmatpush3.msra.mxu1 %v1468_v48 }
 0x936   :  { %2045 = vmatprep.subr.mxu1 %v2584_v0 }
 0x937   :  { %2046 = vmatpush3.msra.mxu1 %v1467_v49 }
 0x938   :  { %2048 = vmatmul.mubr.msk.f32.vlgmr.msra.gmra.mxu1 %vm558_vm3, %v1471_v50  ;;  %2050 = vmatprep.subr.mxu1 %v2584_v0 }
 0x939   :  { %2051 = vmatpush3.msra.mxu1 %v1483_v10  ;;  %2074 = vmatprep.mubr.msk.f32.mxu1 %vm2585_vm0, %v2584_v0 }
 0x93a   :  { %2052 = vmatprep.subr.mxu1 %v2584_v0 }
 0x93b   :  { %2053 = vmatpush3.msra.mxu1 %v1482_v12 }
 0x93c   :  { %2054 = vmatprep.subr.mxu1 %v2584_v0 }
 0x93d   :  { %2055 = vmatpush3.msra.mxu1 %v1481_v15 }
 0x93e   :  { %2056 = vmatprep.subr.mxu1 %v2584_v0 }
 0x93f   :  { %2057 = vmatpush3.msra.mxu1 %v1480_v41 }
 0x940   :  { %2058 = vmatprep.subr.mxu1 %v2584_v0 }
 0x941   :  { %2059 = vmatpush3.msra.mxu1 %v1479_v51 }
 0x942   :  { %2060 = vmatprep.subr.mxu1 %v2584_v0 }
 0x943   :  { %2061 = vmatpush3.msra.mxu1 %v1478_v52 }
 0x944   :  { %2062 = vmatprep.subr.mxu1 %v2584_v0 }
 0x945   :  { %2063 = vmatpush3.msra.mxu1 %v1477_v53 }
 0x946   :  { %2064 = vmatprep.subr.mxu1 %v2584_v0 }
 0x947   :  { %2065 = vmatpush3.msra.mxu1 %v1476_v54 }
 0x948   :  { %2066 = vmatprep.subr.mxu1 %v2584_v0 }
 0x949   :  { %2067 = vmatpush3.msra.mxu1 %v1475_v55 }
 0x94a   :  { %2068 = vmatprep.subr.mxu1 %v2584_v0 }
 0x94b   :  { %2069 = vmatpush3.msra.mxu1 %v1474_v56 }
 0x94c   :  { %2070 = vmatprep.subr.mxu1 %v2584_v0 }
 0x94d   :  { %2071 = vmatpush3.msra.mxu1 %v1473_v57 }
 0x94e   :  { %2072 = vmatprep.subr.mxu1 %v2584_v0 }
 0x94f   :  { %2073 = vmatpush3.msra.mxu1 %v1472_v58 }
 0x9f8   :  { %v1553_v59 = vpop.f32.mrf.mxu1 }
 0x9f9   :  { %2075 = vmatmul.mubr.msk.f32.vlgmr.msra.gmra.mxu1 %vm350_vm1, %v1553_v59 }
 0x9fa   :  { %v2049_v60 = vpop.f32.mrf.mxu1 }
 0xab9   :  { %v1627_v62 = vpop.f32.mrf.mxu1 }
 0xaba   :  { %v1628_v63 = vadd.f32 %v1627_v62, %v1557_v61 }
 0xabb   :  { %v2076_v1 = vpop.f32.mrf.mxu1 }
 0xabc   :  { %v1631_v2 = vadd.f32 %v1628_v63, %v2836_v13 }
 0xabe   :  { %1632 = vst.msk [vmem:[#allocation32] sm:$0xff] %vm350_vm1, %v1631_v2 }
 0xabf   :  { %2532 = shalt.err (!%p2529_p1)
}
 0xac0   :  { %1642 = dma.vmem_to_hbm [thread:$0]  %s1640_s28, 128, %s3006_s24, [#allocation4]  }
 0xac1   :  { %2561 = dma.done.wait [#allocation4], 128  }
 0xac2   :  { %2562 = vsyncadd [#allocation4], 4294967168 }
 0xac3   :  { %1646 = vsyncpa [#allocation3], 1 }
 0xac4   :  { %1647 = vsyncpa [#allocation6], 1 }
 0xac5   :  { %1648 = vsyncpa [#allocation9], 1 }
 0xac6   :  { %1649 = vsyncpa [#allocation12], 1 }
 0xac7   :  { %1650 = vsyncpa [#allocation15], 1 }
 0xac8   :  { %1651 = vsyncpa [#allocation18], 1 }
 0xac9   :  { %1652 = vsyncpa [#allocation21], 1 }
 0xaca   :  { %1653 = vsyncpa [#allocation24], 1 }
 0xacb   :  { %1654 = vsyncpa [#allocation27], 1 }
 0xacc   :  { %1655 = vsyncpa [#allocation30], 1 }
 0xacd   :  { %1656 = vsyncpa [#allocation4], 1 }

</bundles_post_ra>
